<compile_context>
chip_gen: v7x
topology: tpu7x:2x2x1
jax: 0.10.0
libtpu: 0.0.40
codegen_flags: <defaults>
</compile_context>

<pallas_src>
import functools

import jax
import jax.numpy as jnp
from jax import lax
from jax.experimental import pallas as pl
from jax.experimental.pallas import tpu as pltpu


def _round_up(x, m):
    return (x + m - 1) // m * m


# ----------------------------------------------------------------------------
# Fused kernel: per chunk of TS timesteps
#   prologue : xp_chunk = emb_chunk @ W_ih + b           (one MXU GEMM)
#   loop     : gates = xp[t] + h @ W_hh ; LSTM cell       (TS serial steps)
#   epilogue : logits_chunk = H_chunk @ [W_lin1|W_lin2]   (lane-dense store)
# ----------------------------------------------------------------------------
def _make_fused_lstm_kernel(ts, b_blk, hp):
    g4 = 4 * hp

    def kernel(emb_ref, h0_ref, c0_ref, wih_ref, whh_ref, blstm_ref,
               wdec_ref, bdec_ref,
               logits_ref, hT_ref, cT_ref,
               h_sc, c_sc, xp_buf, hbuf):
        chunk = pl.program_id(1)          # time-chunk axis (sequential)

        @pl.when(chunk == 0)
        def _():
            h_sc[...] = h0_ref[...]
            c_sc[...] = c0_ref[...]

        # ---- fused input projection for this (ts, b_blk) chunk -----------
        ep = emb_ref.shape[-1]
        x2d = emb_ref[...].reshape(ts * b_blk, ep)              # bf16, free
        xp = jnp.dot(x2d, wih_ref[...],
                     preferred_element_type=jnp.float32) + blstm_ref[...]
        xp_buf[...] = xp.reshape(ts, b_blk, g4)                 # f32, VMEM

        whh = whh_ref[...]                                      # bf16 (HP,4HP)

        def step(s, carry):
            h, c = carry                                        # f32 (b_blk,HP)
            gates = xp_buf[s] + jnp.dot(h.astype(whh.dtype), whh,
                                        preferred_element_type=jnp.float32)
            # PyTorch gate order i, f, g, o; HP is a multiple of 128 so every
            # slice below is vreg-aligned (no lane shuffles).
            i = jax.nn.sigmoid(gates[:, 0 * hp:1 * hp])
            f = jax.nn.sigmoid(gates[:, 1 * hp:2 * hp])
            g = jnp.tanh(gates[:, 2 * hp:3 * hp])
            o = jax.nn.sigmoid(gates[:, 3 * hp:4 * hp])
            c_new = f * c + i * g
            h_new = o * jnp.tanh(c_new)
            hbuf[s] = h_new.astype(hbuf.dtype)                  # bf16 slab
            return h_new, c_new

        h_fin, c_fin = lax.fori_loop(0, ts, step,
                                     (h_sc[...], c_sc[...]),
                                     unroll=min(8, ts))
        h_sc[...] = h_fin
        c_sc[...] = c_fin

        # ---- fused LinearDecoder1 || LinearDecoder2 epilogue ---------------
        ntp = wdec_ref.shape[-1]
        logits = jnp.dot(hbuf[...].reshape(ts * b_blk, hp), wdec_ref[...],
                         preferred_element_type=jnp.float32) + bdec_ref[...]
        logits_ref[...] = logits.reshape(ts, b_blk, ntp)        # lane-dense

        # hT/cT blocks have a constant index_map along the time-chunk axis,
        # so they stay resident in VMEM and are written back to HBM once;
        # only the last chunk's write is the one that lands.
        @pl.when(chunk == pl.num_programs(1) - 1)
        def _():
            hT_ref[...] = h_sc[...]
            cT_ref[...] = c_sc[...]

    return kernel


def _vmem_budget(ts, b_blk, ep, hp, ntp):
    """Rough per-chunk VMEM budget (double-buffered streams + scratch)."""
    g4 = 4 * hp
    bf, f4 = 2, 4
    stream = 2 * (ts * b_blk * ep * bf)                         # emb chunk
    out = 2 * (ts * b_blk * ntp * f4) + 4 * (b_blk * hp * f4)   # logits, hT/cT
    weights = 2 * ((ep * g4 + hp * g4 + hp * ntp) * bf + (g4 + ntp) * f4)
    state_in = 2 * (2 * b_blk * hp * f4)                        # h0, c0
    scratch = (2 * b_blk * hp * f4                              # h/c carry
               + ts * b_blk * g4 * f4                           # xp chunk
               + ts * b_blk * hp * bf)                          # hidden slab
    est = stream + out + weights + state_in + scratch
    # Generous headroom for Mosaic internal scratch; stay under v7x's 64 MiB.
    return int(min(max(4 * est, 16 * 2 ** 20), 60 * 2 ** 20))


def _lstm_joint_decode(emb, h0, c0, w_ih, w_hh, b_lstm, w_dec, b_dec, *, ts):
    """emb (T,B,EP) bf16; h0/c0 (B,HP) f32; w_ih (EP,4HP)/w_hh (HP,4HP)/
    w_dec (HP,NTp) bf16; b_lstm (1,4HP)/b_dec (1,NTp) f32.
    Returns logits (T,B,NTp) f32, hT (B,HP) f32, cT (B,HP) f32."""
    T, B, EP = emb.shape
    HP = h0.shape[-1]
    G4 = 4 * HP
    NTp = w_dec.shape[-1]
    assert T % ts == 0, "T must be divisible by ts (pad ragged sequences)"
    n_chunks = T // ts

    # Batch-parallel axis: shards independent sequences across v7x's two
    # TensorCores; degenerates to a single block for small batches / 1-TC chips.
    nb = 2 if (B % 2 == 0 and (B // 2) % 8 == 0) else 1
    b_blk = B // nb

    kernel = _make_fused_lstm_kernel(ts, b_blk, HP)

    return pl.pallas_call(
        kernel,
        out_shape=(jax.ShapeDtypeStruct((T, B, NTp), jnp.float32),
                   jax.ShapeDtypeStruct((B, HP), jnp.float32),
                   jax.ShapeDtypeStruct((B, HP), jnp.float32)),
        grid_spec=pltpu.PrefetchScalarGridSpec(
            num_scalar_prefetch=0,
            grid=(nb, n_chunks),
            in_specs=[
                pl.BlockSpec((ts, b_blk, EP), lambda bi, t: (t, bi, 0)),  # emb
                pl.BlockSpec((b_blk, HP), lambda bi, t: (bi, 0)),         # h0
                pl.BlockSpec((b_blk, HP), lambda bi, t: (bi, 0)),         # c0
                pl.BlockSpec((EP, G4), lambda bi, t: (0, 0)),             # W_ih
                pl.BlockSpec((HP, G4), lambda bi, t: (0, 0)),             # W_hh
                pl.BlockSpec((1, G4), lambda bi, t: (0, 0)),              # b
                pl.BlockSpec((HP, NTp), lambda bi, t: (0, 0)),            # W_dec
                pl.BlockSpec((1, NTp), lambda bi, t: (0, 0)),             # b_dec
            ],
            out_specs=(
                pl.BlockSpec((ts, b_blk, NTp), lambda bi, t: (t, bi, 0)),
                pl.BlockSpec((b_blk, HP), lambda bi, t: (bi, 0)),         # hT
                pl.BlockSpec((b_blk, HP), lambda bi, t: (bi, 0)),         # cT
            ),
            scratch_shapes=[
                pltpu.VMEM((b_blk, HP), jnp.float32),         # h carry
                pltpu.VMEM((b_blk, HP), jnp.float32),         # c carry
                pltpu.VMEM((ts, b_blk, G4), jnp.float32),     # xp chunk
                pltpu.VMEM((ts, b_blk, HP), jnp.bfloat16),    # hidden slab
            ],
        ),
        compiler_params=pltpu.CompilerParams(
            dimension_semantics=("parallel", "arbitrary"),
            vmem_limit_bytes=_vmem_budget(ts, b_blk, EP, HP, NTp)),
    )(emb, h0, c0, w_ih, w_hh, b_lstm, w_dec, b_dec)


# ----------------------------------------------------------------------------
# JointModel forward (Joint mode, same layer): embed -> LSTM -> two decoders
# ----------------------------------------------------------------------------
@functools.partial(jax.jit, static_argnames=("ts", "ntags1", "ntags2"))
def joint_model_forward(tokens, h0, c0, params, *, ts, ntags1, ntags2):
    T, B = tokens.shape
    E = params["embed"].shape[1]
    H = params["w_hh"].shape[0]
    HP = _round_up(H, 128)
    EP = _round_up(E, 128)
    nt = ntags1 + ntags2
    NTp = _round_up(nt, 128)
    cdt = jnp.bfloat16     # streamed / weight dtype (f32 accumulation in-kernel)

    # Embedding lookup (HBM gather, plain-JAX glue); dropout = identity (eval).
    embed_p = jnp.pad(params["embed"], ((0, 0), (0, EP - E))).astype(cdt)
    emb = jnp.take(embed_p, tokens, axis=0)                     # (T, B, EP)

    # Per-gate zero padding (gate order i|f|g|o) keeps LSTM semantics exact:
    # padded hidden dims get gate pre-activations of exactly 0 and stay 0.
    def pad_gates(w, rows, rows_p):
        w = w.reshape(rows, 4, H)
        w = jnp.pad(w, ((0, rows_p - rows), (0, 0), (0, HP - H)))
        return w.reshape(rows_p, 4 * HP)

    w_ih = pad_gates(params["w_ih"], E, EP).astype(cdt)
    w_hh = pad_gates(params["w_hh"], H, HP).astype(cdt)
    b_lstm = jnp.pad(params["b_lstm"].reshape(1, 4, H),
                     ((0, 0), (0, 0), (0, HP - H))).reshape(1, 4 * HP)

    # Fused decoder weight [W_lin1 | W_lin2], zero-padded to 128-lane output.
    w_dec = jnp.concatenate([params["w_lin1"], params["w_lin2"]], axis=1)
    w_dec = jnp.pad(w_dec, ((0, HP - H), (0, NTp - nt))).astype(cdt)
    b_dec = jnp.concatenate([params["b_lin1"], params["b_lin2"]], axis=1)
    b_dec = jnp.pad(b_dec, ((0, 0), (0, NTp - nt)))

    h0p = jnp.pad(h0, ((0, 0), (0, HP - H)))
    c0p = jnp.pad(c0, ((0, 0), (0, HP - H)))

    logits, hT, cT = _lstm_joint_decode(emb, h0p, c0p, w_ih, w_hh, b_lstm,
                                        w_dec, b_dec, ts=ts)

    outputs1 = logits[:, :, :ntags1]
    outputs2 = logits[:, :, ntags1:nt]
    # hidden mirrors PyTorch: (nlayers*(1+bi), B, H) each for h and c
    hidden = (hT[None, :, :H], cT[None, :, :H])
    return outputs1, outputs2, hidden


def init_params(key, ntoken, emsize, nhid, ntags1, ntags2):
    ks = jax.random.split(key, 8)
    stdv = 1.0 / jnp.sqrt(nhid)
    return {
        # EncoderModel.init_weights: embed ~ U(-0.1, 0.1)
        "embed": jax.random.uniform(ks[0], (ntoken, emsize),
                                    minval=-0.1, maxval=0.1,
                                    dtype=jnp.float32),
        # nn.LSTM default init ~ U(-1/sqrt(H), 1/sqrt(H)); stored pre-transposed
        "w_ih": jax.random.uniform(ks[1], (emsize, 4 * nhid),
                                   minval=-stdv, maxval=stdv,
                                   dtype=jnp.float32),
        "w_hh": jax.random.uniform(ks[2], (nhid, 4 * nhid),
                                   minval=-stdv, maxval=stdv,
                                   dtype=jnp.float32),
        # b_ih + b_hh folded together
        "b_lstm": (jax.random.uniform(ks[3], (1, 4 * nhid),
                                      minval=-stdv, maxval=stdv,
                                      dtype=jnp.float32)
                   + jax.random.uniform(ks[4], (1, 4 * nhid),
                                        minval=-stdv, maxval=stdv,
                                        dtype=jnp.float32)),
        # LinearDecoder.init_weights: weight ~ U(-0.1, 0.1), bias = 0
        "w_lin1": jax.random.uniform(ks[5], (nhid, ntags1),
                                     minval=-0.1, maxval=0.1,
                                     dtype=jnp.float32),
        "b_lin1": jnp.zeros((1, ntags1), jnp.float32),
        "w_lin2": jax.random.uniform(ks[6], (nhid, ntags2),
                                     minval=-0.1, maxval=0.1,
                                     dtype=jnp.float32),
        "b_lin2": jnp.zeros((1, ntags2), jnp.float32),
    }


def _reference_forward(tokens, h0, c0, params, ntags1, ntags2):
    """Pure-JAX f32 reference of the same forward pass (correctness check)."""
    emb = jnp.take(params["embed"], tokens, axis=0)             # (T, B, E)
    H = h0.shape[-1]

    def step(carry, x_t):
        h, c = carry
        gates = x_t @ params["w_ih"] + h @ params["w_hh"] + params["b_lstm"]
        i = jax.nn.sigmoid(gates[:, 0 * H:1 * H])
        f = jax.nn.sigmoid(gates[:, 1 * H:2 * H])
        g = jnp.tanh(gates[:, 2 * H:3 * H])
        o = jax.nn.sigmoid(gates[:, 3 * H:4 * H])
        c_new = f * c + i * g
        h_new = o * jnp.tanh(c_new)
        return (h_new, c_new), h_new

    (hT, cT), outs = lax.scan(step, (h0, c0), emb)
    o1 = outs @ params["w_lin1"] + params["b_lin1"]
    o2 = outs @ params["w_lin2"] + params["b_lin2"]
    return o1, o2, (hT[None], cT[None])


if __name__ == "__main__":
    # JointModel(ntoken, emsize, nhid, ntags1, nlayers1, ntags2, nlayers2,
    #            rnn_type='LSTM', bi=False, train_mode='Joint'),
    # nlayers1 == nlayers2 == 1.
    ntoken, emsize, nhid = 50, 32, 32
    ntags1, ntags2 = 8, 16
    T, B = 8, 8
    TS = 4                       # timesteps per grid step (T % TS == 0)

    key = jax.random.PRNGKey(0)
    k_param, k_tok = jax.random.split(key)

    params = init_params(k_param, ntoken, emsize, nhid, ntags1, ntags2)
    tokens = jax.random.randint(k_tok, (T, B), 0, ntoken, dtype=jnp.int32)

    # EncoderModel.init_hidden: zeros (nlayers*(1+bi), B, H); single layer /
    # uni-directional -> pass the (B, H) slices to the kernel.
    h0 = jnp.zeros((B, nhid), jnp.float32)
    c0 = jnp.zeros((B, nhid), jnp.float32)

    outputs1, outputs2, hidden = joint_model_forward(
        tokens, h0, c0, params, ts=TS, ntags1=ntags1, ntags2=ntags2)
    jax.block_until_ready((outputs1, outputs2, hidden))

    assert outputs1.shape == (T, B, ntags1)
    assert outputs2.shape == (T, B, ntags2)
    assert hidden[0].shape == (1, B, nhid) and hidden[1].shape == (1, B, nhid)

    # Cross-check against a pure-JAX f32 reference (kernel streams bf16 with
    # f32 accumulation -> loosened tolerance, per review guidance).
    with jax.default_matmul_precision("float32"):
        r1, r2, (rh, rc) = _reference_forward(tokens, h0, c0, params,
                                              ntags1, ntags2)
    ok = (bool(jnp.allclose(outputs1, r1, atol=2e-2, rtol=2e-2))
          and bool(jnp.allclose(outputs2, r2, atol=2e-2, rtol=2e-2))
          and bool(jnp.allclose(hidden[0], rh, atol=2e-2, rtol=2e-2))
          and bool(jnp.allclose(hidden[1], rc, atol=2e-2, rtol=2e-2)))
    assert ok, "Pallas output mismatch vs pure-JAX reference"
    print("KERNEL_OK")
</pallas_src>

<mosaic_0001>
module attributes {stable_mosaic.version = 11 : i64} {
  func.func @kernel(%arg0: i32, %arg1: i32, %arg2: memref<4x8x128xbf16, #tpu.memory_space<vmem>>, %arg3: memref<8x128xf32, #tpu.memory_space<vmem>>, %arg4: memref<8x128xf32, #tpu.memory_space<vmem>>, %arg5: memref<128x512xbf16, #tpu.memory_space<vmem>>, %arg6: memref<128x512xbf16, #tpu.memory_space<vmem>>, %arg7: memref<1x512xf32, #tpu.memory_space<vmem>>, %arg8: memref<128x128xbf16, #tpu.memory_space<vmem>>, %arg9: memref<1x128xf32, #tpu.memory_space<vmem>>, %arg10: memref<4x8x128xf32, #tpu.memory_space<vmem>>, %arg11: memref<8x128xf32, #tpu.memory_space<vmem>>, %arg12: memref<8x128xf32, #tpu.memory_space<vmem>>, %arg13: memref<8x128xf32, #tpu.memory_space<vmem>>, %arg14: memref<8x128xf32, #tpu.memory_space<vmem>>, %arg15: memref<4x8x512xf32, #tpu.memory_space<vmem>>, %arg16: memref<4x8x128xbf16, #tpu.memory_space<vmem>>) attributes {dimension_semantics = [#tpu.dimension_semantics<parallel>, #tpu.dimension_semantics<arbitrary>], iteration_bounds = array<i64: 1, 2>, scalar_prefetch = 0 : i64, scratch_operands = 4 : i64, tpu.core_type = #tpu.core_type<tc>, window_params = [{transform_indices = @transform_0, window_bounds = array<i64: 4, 8, 128>}, {transform_indices = @transform_1, window_bounds = array<i64: 8, 128>}, {transform_indices = @transform_2, window_bounds = array<i64: 8, 128>}, {pipeline_mode = #tpu.pipeline_mode<synchronous>, transform_indices = @transform_3, window_bounds = array<i64: 128, 512>}, {pipeline_mode = #tpu.pipeline_mode<synchronous>, transform_indices = @transform_4, window_bounds = array<i64: 128, 512>}, {pipeline_mode = #tpu.pipeline_mode<synchronous>, transform_indices = @transform_5, window_bounds = array<i64: 1, 512>}, {pipeline_mode = #tpu.pipeline_mode<synchronous>, transform_indices = @transform_6, window_bounds = array<i64: 128, 128>}, {pipeline_mode = #tpu.pipeline_mode<synchronous>, transform_indices = @transform_7, window_bounds = array<i64: 1, 128>}, {transform_indices = @transform_8, window_bounds = array<i64: 4, 8, 128>}, {transform_indices = @transform_9, window_bounds = array<i64: 8, 128>}, {transform_indices = @transform_10, window_bounds = array<i64: 8, 128>}]} {
    %c0_i32 = arith.constant 0 : i32
    %0 = arith.cmpi eq, %arg1, %c0_i32 : i32
    %1 = arith.extui %0 : i1 to i32
    %c0_i32_0 = arith.constant 0 : i32
    %2 = arith.cmpi ne, %1, %c0_i32_0 : i32
    scf.if %2 {
      %c0_66 = arith.constant 0 : index
      %c0_67 = arith.constant 0 : index
      %173 = vector.load %arg3[%c0_66, %c0_67] : memref<8x128xf32, #tpu.memory_space<vmem>>, vector<8x128xf32>
      %c0_68 = arith.constant 0 : index
      %c0_69 = arith.constant 0 : index
      %174 = vector.load %arg13[%c0_68, %c0_69] : memref<8x128xf32, #tpu.memory_space<vmem>>, vector<8x128xf32>
      tpu.vector_store %arg13[%c0_68, %c0_69], %173 {strides = array<i32>} : memref<8x128xf32, #tpu.memory_space<vmem>>, vector<8x128xf32>,
      %c0_70 = arith.constant 0 : index
      %c0_71 = arith.constant 0 : index
      %175 = vector.load %arg4[%c0_70, %c0_71] : memref<8x128xf32, #tpu.memory_space<vmem>>, vector<8x128xf32>
      %c0_72 = arith.constant 0 : index
      %c0_73 = arith.constant 0 : index
      %176 = vector.load %arg14[%c0_72, %c0_73] : memref<8x128xf32, #tpu.memory_space<vmem>>, vector<8x128xf32>
      tpu.vector_store %arg14[%c0_72, %c0_73], %175 {strides = array<i32>} : memref<8x128xf32, #tpu.memory_space<vmem>>, vector<8x128xf32>,
    } else {
    }
    %c0 = arith.constant 0 : index
    %c0_1 = arith.constant 0 : index
    %c0_2 = arith.constant 0 : index
    %3 = vector.load %arg2[%c0, %c0_1, %c0_2] : memref<4x8x128xbf16, #tpu.memory_space<vmem>>, vector<4x8x128xbf16>
    %4 = vector.shape_cast %3 : vector<4x8x128xbf16> to vector<32x128xbf16>
    %c0_3 = arith.constant 0 : index
    %c0_4 = arith.constant 0 : index
    %5 = vector.load %arg5[%c0_3, %c0_4] : memref<128x512xbf16, #tpu.memory_space<vmem>>, vector<128x512xbf16>
    %cst = arith.constant dense<0.000000e+00> : vector<32x512xf32>
    %6 = tpu.matmul %4, %5, %cst {dimension_numbers = #tpu.dot_dimension_numbers<[1], [0], [0], [1], [0, 0, 1, 1], [], []>} : vector<32x128xbf16>, vector<128x512xbf16>, vector<32x512xf32> -> vector<32x512xf32>
    %c0_5 = arith.constant 0 : index
    %c0_6 = arith.constant 0 : index
    %7 = vector.load %arg7[%c0_5, %c0_6] : memref<1x512xf32, #tpu.memory_space<vmem>>, vector<1x512xf32>
    %8 = vector.broadcast %7 : vector<1x512xf32> to vector<32x512xf32>
    %9 = arith.addf %6, %8 : vector<32x512xf32>
    %10 = vector.shape_cast %9 : vector<32x512xf32> to vector<4x8x512xf32>
    %c0_7 = arith.constant 0 : index
    %c0_8 = arith.constant 0 : index
    %c0_9 = arith.constant 0 : index
    %11 = vector.load %arg15[%c0_7, %c0_8, %c0_9] : memref<4x8x512xf32, #tpu.memory_space<vmem>>, vector<4x8x512xf32>
    tpu.vector_store %arg15[%c0_7, %c0_8, %c0_9], %10 {strides = array<i32>} : memref<4x8x512xf32, #tpu.memory_space<vmem>>, vector<4x8x512xf32>,
    %c0_10 = arith.constant 0 : index
    %c0_11 = arith.constant 0 : index
    %12 = vector.load %arg6[%c0_10, %c0_11] : memref<128x512xbf16, #tpu.memory_space<vmem>>, vector<128x512xbf16>
    %c0_12 = arith.constant 0 : index
    %c0_13 = arith.constant 0 : index
    %13 = vector.load %arg13[%c0_12, %c0_13] : memref<8x128xf32, #tpu.memory_space<vmem>>, vector<8x128xf32>
    %c0_14 = arith.constant 0 : index
    %c0_15 = arith.constant 0 : index
    %14 = vector.load %arg14[%c0_14, %c0_15] : memref<8x128xf32, #tpu.memory_space<vmem>>, vector<8x128xf32>
    %c0_i32_16 = arith.constant 0 : i32
    %15 = arith.index_cast %c0_i32_16 : i32 to index
    %c0_17 = arith.constant 0 : index
    %c0_18 = arith.constant 0 : index
    %16 = vector.load %arg15[%15, %c0_17, %c0_18] : memref<4x8x512xf32, #tpu.memory_space<vmem>>, vector<1x8x512xf32>
    %17 = vector.shape_cast %16 : vector<1x8x512xf32> to vector<8x512xf32>
    %18 = arith.truncf %13 : vector<8x128xf32> to vector<8x128xbf16>
    %cst_19 = arith.constant dense<0.000000e+00> : vector<8x512xf32>
    %19 = tpu.matmul %18, %12, %cst_19 {dimension_numbers = #tpu.dot_dimension_numbers<[1], [0], [0], [1], [0, 0, 1, 1], [], []>} : vector<8x128xbf16>, vector<128x512xbf16>, vector<8x512xf32> -> vector<8x512xf32>
    %20 = arith.addf %17, %19 : vector<8x512xf32>
    %21 = vector.extract_strided_slice %20 {offsets = [0, 0], sizes = [8, 128], strides = [1, 1]} : vector<8x512xf32> to vector<8x128xf32>
    %22 = arith.negf %21 : vector<8x128xf32>
    %23 = math.exp %22 : vector<8x128xf32>
    %cst_20 = arith.constant 1.000000e+00 : f32
    %24 = vector.broadcast %cst_20 : f32 to vector<8x128xf32>
    %25 = arith.addf %24, %23 : vector<8x128xf32>
    %26 = arith.divf %24, %25 : vector<8x128xf32>
    %27 = vector.extract_strided_slice %20 {offsets = [0, 128], sizes = [8, 128], strides = [1, 1]} : vector<8x512xf32> to vector<8x128xf32>
    %28 = arith.negf %27 : vector<8x128xf32>
    %29 = math.exp %28 : vector<8x128xf32>
    %cst_21 = arith.constant 1.000000e+00 : f32
    %30 = vector.broadcast %cst_21 : f32 to vector<8x128xf32>
    %31 = arith.addf %30, %29 : vector<8x128xf32>
    %32 = arith.divf %30, %31 : vector<8x128xf32>
    %33 = vector.extract_strided_slice %20 {offsets = [0, 256], sizes = [8, 128], strides = [1, 1]} : vector<8x512xf32> to vector<8x128xf32>
    %34 = math.tanh %33 : vector<8x128xf32>
    %35 = vector.extract_strided_slice %20 {offsets = [0, 384], sizes = [8, 128], strides = [1, 1]} : vector<8x512xf32> to vector<8x128xf32>
    %36 = arith.negf %35 : vector<8x128xf32>
    %37 = math.exp %36 : vector<8x128xf32>
    %cst_22 = arith.constant 1.000000e+00 : f32
    %38 = vector.broadcast %cst_22 : f32 to vector<8x128xf32>
    %39 = arith.addf %38, %37 : vector<8x128xf32>
    %40 = arith.divf %38, %39 : vector<8x128xf32>
    %41 = arith.mulf %32, %14 : vector<8x128xf32>
    %42 = arith.mulf %26, %34 : vector<8x128xf32>
    %43 = arith.addf %41, %42 : vector<8x128xf32>
    %44 = math.tanh %43 : vector<8x128xf32>
    %45 = arith.mulf %40, %44 : vector<8x128xf32>
    %46 = arith.truncf %45 : vector<8x128xf32> to vector<8x128xbf16>
    %47 = arith.index_cast %c0_i32_16 : i32 to index
    %c0_23 = arith.constant 0 : index
    %c0_24 = arith.constant 0 : index
    %48 = vector.load %arg16[%47, %c0_23, %c0_24] : memref<4x8x128xbf16, #tpu.memory_space<vmem>>, vector<1x8x128xbf16>
    %49 = vector.shape_cast %48 : vector<1x8x128xbf16> to vector<8x128xbf16>
    %50 = vector.shape_cast %46 : vector<8x128xbf16> to vector<1x8x128xbf16>
    tpu.vector_store %arg16[%47, %c0_23, %c0_24], %50 {strides = array<i32>} : memref<4x8x128xbf16, #tpu.memory_space<vmem>>, vector<1x8x128xbf16>,
    %c1_i32 = arith.constant 1 : i32
    %51 = arith.index_cast %c1_i32 : i32 to index
    %c0_25 = arith.constant 0 : index
    %c0_26 = arith.constant 0 : index
    %52 = vector.load %arg15[%51, %c0_25, %c0_26] : memref<4x8x512xf32, #tpu.memory_space<vmem>>, vector<1x8x512xf32>
    %53 = vector.shape_cast %52 : vector<1x8x512xf32> to vector<8x512xf32>
    %54 = arith.truncf %45 : vector<8x128xf32> to vector<8x128xbf16>
    %cst_27 = arith.constant dense<0.000000e+00> : vector<8x512xf32>
    %55 = tpu.matmul %54, %12, %cst_27 {dimension_numbers = #tpu.dot_dimension_numbers<[1], [0], [0], [1], [0, 0, 1, 1], [], []>} : vector<8x128xbf16>, vector<128x512xbf16>, vector<8x512xf32> -> vector<8x512xf32>
    %56 = arith.addf %53, %55 : vector<8x512xf32>
    %57 = vector.extract_strided_slice %56 {offsets = [0, 0], sizes = [8, 128], strides = [1, 1]} : vector<8x512xf32> to vector<8x128xf32>
    %58 = arith.negf %57 : vector<8x128xf32>
    %59 = math.exp %58 : vector<8x128xf32>
    %cst_28 = arith.constant 1.000000e+00 : f32
    %60 = vector.broadcast %cst_28 : f32 to vector<8x128xf32>
    %61 = arith.addf %60, %59 : vector<8x128xf32>
    %62 = arith.divf %60, %61 : vector<8x128xf32>
    %63 = vector.extract_strided_slice %56 {offsets = [0, 128], sizes = [8, 128], strides = [1, 1]} : vector<8x512xf32> to vector<8x128xf32>
    %64 = arith.negf %63 : vector<8x128xf32>
    %65 = math.exp %64 : vector<8x128xf32>
    %cst_29 = arith.constant 1.000000e+00 : f32
    %66 = vector.broadcast %cst_29 : f32 to vector<8x128xf32>
    %67 = arith.addf %66, %65 : vector<8x128xf32>
    %68 = arith.divf %66, %67 : vector<8x128xf32>
    %69 = vector.extract_strided_slice %56 {offsets = [0, 256], sizes = [8, 128], strides = [1, 1]} : vector<8x512xf32> to vector<8x128xf32>
    %70 = math.tanh %69 : vector<8x128xf32>
    %71 = vector.extract_strided_slice %56 {offsets = [0, 384], sizes = [8, 128], strides = [1, 1]} : vector<8x512xf32> to vector<8x128xf32>
    %72 = arith.negf %71 : vector<8x128xf32>
    %73 = math.exp %72 : vector<8x128xf32>
    %cst_30 = arith.constant 1.000000e+00 : f32
    %74 = vector.broadcast %cst_30 : f32 to vector<8x128xf32>
    %75 = arith.addf %74, %73 : vector<8x128xf32>
    %76 = arith.divf %74, %75 : vector<8x128xf32>
    %77 = arith.mulf %68, %43 : vector<8x128xf32>
    %78 = arith.mulf %62, %70 : vector<8x128xf32>
    %79 = arith.addf %77, %78 : vector<8x128xf32>
    %80 = math.tanh %79 : vector<8x128xf32>
    %81 = arith.mulf %76, %80 : vector<8x128xf32>
    %82 = arith.truncf %81 : vector<8x128xf32> to vector<8x128xbf16>
    %83 = arith.index_cast %c1_i32 : i32 to index
    %c0_31 = arith.constant 0 : index
    %c0_32 = arith.constant 0 : index
    %84 = vector.load %arg16[%83, %c0_31, %c0_32] : memref<4x8x128xbf16, #tpu.memory_space<vmem>>, vector<1x8x128xbf16>
    %85 = vector.shape_cast %84 : vector<1x8x128xbf16> to vector<8x128xbf16>
    %86 = vector.shape_cast %82 : vector<8x128xbf16> to vector<1x8x128xbf16>
    tpu.vector_store %arg16[%83, %c0_31, %c0_32], %86 {strides = array<i32>} : memref<4x8x128xbf16, #tpu.memory_space<vmem>>, vector<1x8x128xbf16>,
    %c2_i32 = arith.constant 2 : i32
    %87 = arith.index_cast %c2_i32 : i32 to index
    %c0_33 = arith.constant 0 : index
    %c0_34 = arith.constant 0 : index
    %88 = vector.load %arg15[%87, %c0_33, %c0_34] : memref<4x8x512xf32, #tpu.memory_space<vmem>>, vector<1x8x512xf32>
    %89 = vector.shape_cast %88 : vector<1x8x512xf32> to vector<8x512xf32>
    %90 = arith.truncf %81 : vector<8x128xf32> to vector<8x128xbf16>
    %cst_35 = arith.constant dense<0.000000e+00> : vector<8x512xf32>
    %91 = tpu.matmul %90, %12, %cst_35 {dimension_numbers = #tpu.dot_dimension_numbers<[1], [0], [0], [1], [0, 0, 1, 1], [], []>} : vector<8x128xbf16>, vector<128x512xbf16>, vector<8x512xf32> -> vector<8x512xf32>
    %92 = arith.addf %89, %91 : vector<8x512xf32>
    %93 = vector.extract_strided_slice %92 {offsets = [0, 0], sizes = [8, 128], strides = [1, 1]} : vector<8x512xf32> to vector<8x128xf32>
    %94 = arith.negf %93 : vector<8x128xf32>
    %95 = math.exp %94 : vector<8x128xf32>
    %cst_36 = arith.constant 1.000000e+00 : f32
    %96 = vector.broadcast %cst_36 : f32 to vector<8x128xf32>
    %97 = arith.addf %96, %95 : vector<8x128xf32>
    %98 = arith.divf %96, %97 : vector<8x128xf32>
    %99 = vector.extract_strided_slice %92 {offsets = [0, 128], sizes = [8, 128], strides = [1, 1]} : vector<8x512xf32> to vector<8x128xf32>
    %100 = arith.negf %99 : vector<8x128xf32>
    %101 = math.exp %100 : vector<8x128xf32>
    %cst_37 = arith.constant 1.000000e+00 : f32
    %102 = vector.broadcast %cst_37 : f32 to vector<8x128xf32>
    %103 = arith.addf %102, %101 : vector<8x128xf32>
    %104 = arith.divf %102, %103 : vector<8x128xf32>
    %105 = vector.extract_strided_slice %92 {offsets = [0, 256], sizes = [8, 128], strides = [1, 1]} : vector<8x512xf32> to vector<8x128xf32>
    %106 = math.tanh %105 : vector<8x128xf32>
    %107 = vector.extract_strided_slice %92 {offsets = [0, 384], sizes = [8, 128], strides = [1, 1]} : vector<8x512xf32> to vector<8x128xf32>
    %108 = arith.negf %107 : vector<8x128xf32>
    %109 = math.exp %108 : vector<8x128xf32>
    %cst_38 = arith.constant 1.000000e+00 : f32
    %110 = vector.broadcast %cst_38 : f32 to vector<8x128xf32>
    %111 = arith.addf %110, %109 : vector<8x128xf32>
    %112 = arith.divf %110, %111 : vector<8x128xf32>
    %113 = arith.mulf %104, %79 : vector<8x128xf32>
    %114 = arith.mulf %98, %106 : vector<8x128xf32>
    %115 = arith.addf %113, %114 : vector<8x128xf32>
    %116 = math.tanh %115 : vector<8x128xf32>
    %117 = arith.mulf %112, %116 : vector<8x128xf32>
    %118 = arith.truncf %117 : vector<8x128xf32> to vector<8x128xbf16>
    %119 = arith.index_cast %c2_i32 : i32 to index
    %c0_39 = arith.constant 0 : index
    %c0_40 = arith.constant 0 : index
    %120 = vector.load %arg16[%119, %c0_39, %c0_40] : memref<4x8x128xbf16, #tpu.memory_space<vmem>>, vector<1x8x128xbf16>
    %121 = vector.shape_cast %120 : vector<1x8x128xbf16> to vector<8x128xbf16>
    %122 = vector.shape_cast %118 : vector<8x128xbf16> to vector<1x8x128xbf16>
    tpu.vector_store %arg16[%119, %c0_39, %c0_40], %122 {strides = array<i32>} : memref<4x8x128xbf16, #tpu.memory_space<vmem>>, vector<1x8x128xbf16>,
    %c3_i32 = arith.constant 3 : i32
    %123 = arith.index_cast %c3_i32 : i32 to index
    %c0_41 = arith.constant 0 : index
    %c0_42 = arith.constant 0 : index
    %124 = vector.load %arg15[%123, %c0_41, %c0_42] : memref<4x8x512xf32, #tpu.memory_space<vmem>>, vector<1x8x512xf32>
    %125 = vector.shape_cast %124 : vector<1x8x512xf32> to vector<8x512xf32>
    %126 = arith.truncf %117 : vector<8x128xf32> to vector<8x128xbf16>
    %cst_43 = arith.constant dense<0.000000e+00> : vector<8x512xf32>
    %127 = tpu.matmul %126, %12, %cst_43 {dimension_numbers = #tpu.dot_dimension_numbers<[1], [0], [0], [1], [0, 0, 1, 1], [], []>} : vector<8x128xbf16>, vector<128x512xbf16>, vector<8x512xf32> -> vector<8x512xf32>
    %128 = arith.addf %125, %127 : vector<8x512xf32>
    %129 = vector.extract_strided_slice %128 {offsets = [0, 0], sizes = [8, 128], strides = [1, 1]} : vector<8x512xf32> to vector<8x128xf32>
    %130 = arith.negf %129 : vector<8x128xf32>
    %131 = math.exp %130 : vector<8x128xf32>
    %cst_44 = arith.constant 1.000000e+00 : f32
    %132 = vector.broadcast %cst_44 : f32 to vector<8x128xf32>
    %133 = arith.addf %132, %131 : vector<8x128xf32>
    %134 = arith.divf %132, %133 : vector<8x128xf32>
    %135 = vector.extract_strided_slice %128 {offsets = [0, 128], sizes = [8, 128], strides = [1, 1]} : vector<8x512xf32> to vector<8x128xf32>
    %136 = arith.negf %135 : vector<8x128xf32>
    %137 = math.exp %136 : vector<8x128xf32>
    %cst_45 = arith.constant 1.000000e+00 : f32
    %138 = vector.broadcast %cst_45 : f32 to vector<8x128xf32>
    %139 = arith.addf %138, %137 : vector<8x128xf32>
    %140 = arith.divf %138, %139 : vector<8x128xf32>
    %141 = vector.extract_strided_slice %128 {offsets = [0, 256], sizes = [8, 128], strides = [1, 1]} : vector<8x512xf32> to vector<8x128xf32>
    %142 = math.tanh %141 : vector<8x128xf32>
    %143 = vector.extract_strided_slice %128 {offsets = [0, 384], sizes = [8, 128], strides = [1, 1]} : vector<8x512xf32> to vector<8x128xf32>
    %144 = arith.negf %143 : vector<8x128xf32>
    %145 = math.exp %144 : vector<8x128xf32>
    %cst_46 = arith.constant 1.000000e+00 : f32
    %146 = vector.broadcast %cst_46 : f32 to vector<8x128xf32>
    %147 = arith.addf %146, %145 : vector<8x128xf32>
    %148 = arith.divf %146, %147 : vector<8x128xf32>
    %149 = arith.mulf %140, %115 : vector<8x128xf32>
    %150 = arith.mulf %134, %142 : vector<8x128xf32>
    %151 = arith.addf %149, %150 : vector<8x128xf32>
    %152 = math.tanh %151 : vector<8x128xf32>
    %153 = arith.mulf %148, %152 : vector<8x128xf32>
    %154 = arith.truncf %153 : vector<8x128xf32> to vector<8x128xbf16>
    %155 = arith.index_cast %c3_i32 : i32 to index
    %c0_47 = arith.constant 0 : index
    %c0_48 = arith.constant 0 : index
    %156 = vector.load %arg16[%155, %c0_47, %c0_48] : memref<4x8x128xbf16, #tpu.memory_space<vmem>>, vector<1x8x128xbf16>
    %157 = vector.shape_cast %156 : vector<1x8x128xbf16> to vector<8x128xbf16>
    %158 = vector.shape_cast %154 : vector<8x128xbf16> to vector<1x8x128xbf16>
    tpu.vector_store %arg16[%155, %c0_47, %c0_48], %158 {strides = array<i32>} : memref<4x8x128xbf16, #tpu.memory_space<vmem>>, vector<1x8x128xbf16>,
    %c4_i32 = arith.constant 4 : i32
    %c0_49 = arith.constant 0 : index
    %c0_50 = arith.constant 0 : index
    %159 = vector.load %arg13[%c0_49, %c0_50] : memref<8x128xf32, #tpu.memory_space<vmem>>, vector<8x128xf32>
    tpu.vector_store %arg13[%c0_49, %c0_50], %153 {strides = array<i32>} : memref<8x128xf32, #tpu.memory_space<vmem>>, vector<8x128xf32>,
    %c0_51 = arith.constant 0 : index
    %c0_52 = arith.constant 0 : index
    %160 = vector.load %arg14[%c0_51, %c0_52] : memref<8x128xf32, #tpu.memory_space<vmem>>, vector<8x128xf32>
    tpu.vector_store %arg14[%c0_51, %c0_52], %151 {strides = array<i32>} : memref<8x128xf32, #tpu.memory_space<vmem>>, vector<8x128xf32>,
    %c0_53 = arith.constant 0 : index
    %c0_54 = arith.constant 0 : index
    %c0_55 = arith.constant 0 : index
    %161 = vector.load %arg16[%c0_53, %c0_54, %c0_55] : memref<4x8x128xbf16, #tpu.memory_space<vmem>>, vector<4x8x128xbf16>
    %162 = vector.shape_cast %161 : vector<4x8x128xbf16> to vector<32x128xbf16>
    %c0_56 = arith.constant 0 : index
    %c0_57 = arith.constant 0 : index
    %163 = vector.load %arg8[%c0_56, %c0_57] : memref<128x128xbf16, #tpu.memory_space<vmem>>, vector<128x128xbf16>
    %cst_58 = arith.constant dense<0.000000e+00> : vector<32x128xf32>
    %164 = tpu.matmul %162, %163, %cst_58 {dimension_numbers = #tpu.dot_dimension_numbers<[1], [0], [0], [1], [0, 0, 1, 1], [], []>} : vector<32x128xbf16>, vector<128x128xbf16>, vector<32x128xf32> -> vector<32x128xf32>
    %c0_59 = arith.constant 0 : index
    %c0_60 = arith.constant 0 : index
    %165 = vector.load %arg9[%c0_59, %c0_60] : memref<1x128xf32, #tpu.memory_space<vmem>>, vector<1x128xf32>
    %166 = vector.broadcast %165 : vector<1x128xf32> to vector<32x128xf32>
    %167 = arith.addf %164, %166 : vector<32x128xf32>
    %168 = vector.shape_cast %167 : vector<32x128xf32> to vector<4x8x128xf32>
    %c0_61 = arith.constant 0 : index
    %c0_62 = arith.constant 0 : index
    %c0_63 = arith.constant 0 : index
    %169 = vector.load %arg10[%c0_61, %c0_62, %c0_63] : memref<4x8x128xf32, #tpu.memory_space<vmem>>, vector<4x8x128xf32>
    tpu.vector_store %arg10[%c0_61, %c0_62, %c0_63], %168 {strides = array<i32>} : memref<4x8x128xf32, #tpu.memory_space<vmem>>, vector<4x8x128xf32>,
    %c1_i32_64 = arith.constant 1 : i32
    %170 = arith.cmpi eq, %arg1, %c1_i32_64 : i32
    %171 = arith.extui %170 : i1 to i32
    %c0_i32_65 = arith.constant 0 : i32
    %172 = arith.cmpi ne, %171, %c0_i32_65 : i32
    scf.if %172 {
      %c0_66 = arith.constant 0 : index
      %c0_67 = arith.constant 0 : index
      %173 = vector.load %arg13[%c0_66, %c0_67] : memref<8x128xf32, #tpu.memory_space<vmem>>, vector<8x128xf32>
      %c0_68 = arith.constant 0 : index
      %c0_69 = arith.constant 0 : index
      %174 = vector.load %arg11[%c0_68, %c0_69] : memref<8x128xf32, #tpu.memory_space<vmem>>, vector<8x128xf32>
      tpu.vector_store %arg11[%c0_68, %c0_69], %173 {strides = array<i32>} : memref<8x128xf32, #tpu.memory_space<vmem>>, vector<8x128xf32>,
      %c0_70 = arith.constant 0 : index
      %c0_71 = arith.constant 0 : index
      %175 = vector.load %arg14[%c0_70, %c0_71] : memref<8x128xf32, #tpu.memory_space<vmem>>, vector<8x128xf32>
      %c0_72 = arith.constant 0 : index
      %c0_73 = arith.constant 0 : index
      %176 = vector.load %arg12[%c0_72, %c0_73] : memref<8x128xf32, #tpu.memory_space<vmem>>, vector<8x128xf32>
      tpu.vector_store %arg12[%c0_72, %c0_73], %175 {strides = array<i32>} : memref<8x128xf32, #tpu.memory_space<vmem>>, vector<8x128xf32>,
    } else {
    }
    return
  }
  func.func @transform_0(%arg0: i32, %arg1: i32) -> (i32, i32, i32) {
    %c0_i32 = arith.constant 0 : i32
    %c0_i32_0 = arith.constant 0 : i32
    return %arg1, %arg0, %c0_i32 : i32, i32, i32
  }
  func.func @transform_1(%arg0: i32, %arg1: i32) -> (i32, i32) {
    %c0_i32 = arith.constant 0 : i32
    %c0_i32_0 = arith.constant 0 : i32
    return %arg0, %c0_i32 : i32, i32
  }
  func.func @transform_2(%arg0: i32, %arg1: i32) -> (i32, i32) {
    %c0_i32 = arith.constant 0 : i32
    %c0_i32_0 = arith.constant 0 : i32
    return %arg0, %c0_i32 : i32, i32
  }
  func.func @transform_3(%arg0: i32, %arg1: i32) -> (i32, i32) {
    %c0_i32 = arith.constant 0 : i32
    %c0_i32_0 = arith.constant 0 : i32
    %c0_i32_1 = arith.constant 0 : i32
    return %c0_i32, %c0_i32_0 : i32, i32
  }
  func.func @transform_4(%arg0: i32, %arg1: i32) -> (i32, i32) {
    %c0_i32 = arith.constant 0 : i32
    %c0_i32_0 = arith.constant 0 : i32
    %c0_i32_1 = arith.constant 0 : i32
    return %c0_i32, %c0_i32_0 : i32, i32
  }
  func.func @transform_5(%arg0: i32, %arg1: i32) -> (i32, i32) {
    %c0_i32 = arith.constant 0 : i32
    %c0_i32_0 = arith.constant 0 : i32
    %c0_i32_1 = arith.constant 0 : i32
    return %c0_i32, %c0_i32_0 : i32, i32
  }
  func.func @transform_6(%arg0: i32, %arg1: i32) -> (i32, i32) {
    %c0_i32 = arith.constant 0 : i32
    %c0_i32_0 = arith.constant 0 : i32
    %c0_i32_1 = arith.constant 0 : i32
    return %c0_i32, %c0_i32_0 : i32, i32
  }
  func.func @transform_7(%arg0: i32, %arg1: i32) -> (i32, i32) {
    %c0_i32 = arith.constant 0 : i32
    %c0_i32_0 = arith.constant 0 : i32
    %c0_i32_1 = arith.constant 0 : i32
    return %c0_i32, %c0_i32_0 : i32, i32
  }
  func.func @transform_8(%arg0: i32, %arg1: i32) -> (i32, i32, i32) {
    %c0_i32 = arith.constant 0 : i32
    %c0_i32_0 = arith.constant 0 : i32
    return %arg1, %arg0, %c0_i32 : i32, i32, i32
  }
  func.func @transform_9(%arg0: i32, %arg1: i32) -> (i32, i32) {
    %c0_i32 = arith.constant 0 : i32
    %c0_i32_0 = arith.constant 0 : i32
    return %arg0, %c0_i32 : i32, i32
  }
  func.func @transform_10(%arg0: i32, %arg1: i32) -> (i32, i32) {
    %c0_i32 = arith.constant 0 : i32
    %c0_i32_0 = arith.constant 0 : i32
    return %arg0, %c0_i32 : i32, i32
  }
}

</mosaic_0001>

<bundles_post_ra>
// kernel: joint_model_forward.1
= control target key start
LH: loop header
LB: loop body
LE: loop exit
PB: predicated region body
PF: predicated region fallthrough
CT: control target
= control target key end

     0   :  { %s2202_s13 = smov 0   ;;  %s2204_s14 = smov 0   ;;  %s2736_s0 = inlined_call_operand.vmem [shape: bf16[8,8,128], index: 0, kind: input, shape index: {}]   ;;  %s2737_s1 = inlined_call_operand.vmem [shape: f32[8,128], index: 1, kind: input, shape index: {}]   ;;  %s2738_s2 = inlined_call_operand.vmem [shape: f32[8,128], index: 2, kind: input, shape index: {}]   ;;  %s2739_s3 = inlined_call_operand.vmem [shape: bf16[128,512], index: 3, kind: input, shape index: {}]   ;;  %s2740_s4 = inlined_call_operand.vmem [shape: bf16[128,512], index: 4, kind: input, shape index: {}]   ;;  %s2741_s5 = inlined_call_operand.vmem [shape: f32[1,512], index: 5, kind: input, shape index: {}]   ;;  %s2742_s6 = inlined_call_operand.vmem [shape: bf16[128,128], index: 6, kind: input, shape index: {}]   ;;  %s2743_s7 = inlined_call_operand.vmem [shape: f32[1,128], index: 7, kind: input, shape index: {}]   ;;  %s2744_s8 = inlined_call_operand.vmem [shape: f32[8,8,128], index: 8, kind: output, shape index: {0}]   ;;  %s2745_s9 = inlined_call_operand.vmem [shape: f32[8,128], index: 9, kind: output, shape index: {1}]   ;;  %s2746_s10 = inlined_call_operand.vmem [shape: f32[8,128], index: 10, kind: output, shape index: {2}]  }
   0x1   :  { %s2206_s15 = smov 0  }
   0x2 LB: > { %s30_s16 = sadd.s32 1, %s2140_s14  ;;  %p1795_p0 = scmp.ge.s32.totalorder %s2144_s15, 1  ;;  %s2144_s15 = sphi %s2206_s15, %s21_s15   ;;  %s2140_s14 = sphi %s2204_s14, %s2765_s14   ;;  %s2136_s13 = sphi %s2202_s13, %s2764_s13  }
   0x3   : > { %p31_p1 = scmp.ge.s32.totalorder %s30_s16, 2  ;;  %p355_p2 = scmp.lt.s32.totalorder %s2144_s15, 3 }
   0x5   : > { %s2767_s16 = smov (%p31_p1, %s30_s16), 0  ;;  %p356_p3 = pnand %p1795_p0, %p355_p2 }
   0x7   : > { %359 = sbr.rel (%p356_p3) target bundleno = 1355 (0x54b), region = 52 }
   0xe   : > { %s1796_s17 = sshll.u32 %s2136_s13, 2  ;;  %p1800_p5 = scmp.ne.s32.totalorder %s2136_s13, 0 }
   0xf   : > { %p416_p4 = scmp.lt.s32.totalorder %s1796_s17, 7  ;;  %v454_v0 = vld [vmem:[%s2737_s1] sm:$0xff] (!%p1800_p5) }
  0x10   : > { %453 = sbr.rel (%p1800_p5) target bundleno = 23 (0x17), region = 56  ;;  %v456_v1 = vld [vmem:[%s2738_s2] sm:$0xff] (!%p1800_p5)  ;;  %455 = vst [vmem:[#allocation2] sm:$0xff] (!%p1800_p5), %v454_v0 }
  0x11   : > { %s2769_s17 = smov (!%p416_p4, %s1796_s17), 7  ;;  %457 = vst [vmem:[#allocation3] sm:$0xff] (!%p1800_p5), %v456_v1 }
  0x12   : > { %s1797_s18 = sshll.u32 %s2769_s17, 2  ;;  %s1799_s19 = sshll.u32 %s2769_s17, 3 }
  0x13   : > { %s2226_s22 = scalar_lea.vmem %s2736_s0, %s1797_s18  ;;  %s2231_s25 = scalar_lea.vmem %s2744_s8, %s1799_s19 }
  0x17 PF: > { %v1950_v2 = vld [vmem:[%s2739_s3 + $0x4] ss:$16 sps:$4 sm:$0xff]   ;;  %v1952_v3 = vld [vmem:[%s2739_s3 + $0xc] ss:$16 sps:$4 sm:$0xff]   ;;  %v2747_v4 = vmov 0   ;;  %p1890_p6 = scmp.ne.s32.totalorder %s2136_s13, 1 }
  0x18   : > { %720 = vmatprep.mubr.bf16.mxu0 %v2747_v4  ;;  %773 = vmatprep.mubr.bf16.mxu1 %v2747_v4  ;;  %v1954_v5 = vld [vmem:[%s2739_s3] ss:$16 sps:$4 sm:$0xff]   ;;  %v1955_v6 = vld [vmem:[%s2739_s3 + $0x8] ss:$16 sps:$4 sm:$0xff]   ;;  %v1956_v7 = vld [vmem:[%s2739_s3 + $0x24] ss:$16 sps:$4 sm:$0xff]  }
  0x19   : > { %688 = vmatprep.subr.bf16.mxu0 %v1950_v2  ;;  %741 = vmatprep.subr.bf16.mxu1 %v1952_v3  ;;  %v1958_v8 = vld [vmem:[%s2739_s3 + $0x2c] ss:$16 sps:$4 sm:$0xff]   ;;  %v1960_v9 = vld [vmem:[%s2739_s3 + $0x20] ss:$16 sps:$4 sm:$0xff]   ;;  %v1961_v10 = vld [vmem:[%s2739_s3 + $0x28] ss:$16 sps:$4 sm:$0xff]  }
  0x1a   : > { %689 = vmatpush1.bf16.msra.mxu0 %v1954_v5  ;;  %742 = vmatpush1.bf16.msra.mxu1 %v1955_v6  ;;  %v1962_v11 = vld [vmem:[%s2739_s3 + $0x44] ss:$16 sps:$4 sm:$0xff]   ;;  %v1964_v12 = vld [vmem:[%s2739_s3 + $0x4c] ss:$16 sps:$4 sm:$0xff]   ;;  %v1966_v13 = vld [vmem:[%s2739_s3 + $0x40] ss:$16 sps:$4 sm:$0xff]  }
  0x1b   : > { %690 = vmatprep.subr.bf16.mxu0 %v1956_v7  ;;  %743 = vmatprep.subr.bf16.mxu1 %v1958_v8  ;;  %v1967_v14 = vld [vmem:[%s2739_s3 + $0x48] ss:$16 sps:$4 sm:$0xff]   ;;  %v1968_v15 = vld [vmem:[%s2739_s3 + $0x64] ss:$16 sps:$4 sm:$0xff]   ;;  %v1970_v16 = vld [vmem:[%s2739_s3 + $0x6c] ss:$16 sps:$4 sm:$0xff]   ;;  %v496_v8 = vlaneseq }
  0x1c   : > { %v1972_v17 = vld [vmem:[%s2739_s3 + $0x60] ss:$16 sps:$4 sm:$0xff]   ;;  %v1973_v18 = vld [vmem:[%s2739_s3 + $0x68] ss:$16 sps:$4 sm:$0xff]   ;;  %v1974_v19 = vld [vmem:[%s2739_s3 + $0x84] ss:$16 sps:$4 sm:$0xff]  }
  0x1d   : > { %v1976_v20 = vld [vmem:[%s2739_s3 + $0x8c] ss:$16 sps:$4 sm:$0xff]   ;;  %v1978_v21 = vld [vmem:[%s2739_s3 + $0x80] ss:$16 sps:$4 sm:$0xff]   ;;  %v1979_v22 = vld [vmem:[%s2739_s3 + $0x88] ss:$16 sps:$4 sm:$0xff]  }
  0x1e   : > { %691 = vmatpush1.bf16.msra.mxu0 %v1960_v9  ;;  %744 = vmatpush1.bf16.msra.mxu1 %v1961_v10  ;;  %v1980_v23 = vld [vmem:[%s2739_s3 + $0xa4] ss:$16 sps:$4 sm:$0xff]   ;;  %v1982_v24 = vld [vmem:[%s2739_s3 + $0xac] ss:$16 sps:$4 sm:$0xff]   ;;  %v1984_v25 = vld [vmem:[%s2739_s3 + $0xa0] ss:$16 sps:$4 sm:$0xff]  }
  0x1f   : > { %692 = vmatprep.subr.bf16.mxu0 %v1962_v11  ;;  %745 = vmatprep.subr.bf16.mxu1 %v1964_v12  ;;  %v1985_v26 = vld [vmem:[%s2739_s3 + $0xa8] ss:$16 sps:$4 sm:$0xff]   ;;  %v1986_v27 = vld [vmem:[%s2739_s3 + $0xc4] ss:$16 sps:$4 sm:$0xff]   ;;  %v1988_v28 = vld [vmem:[%s2739_s3 + $0xcc] ss:$16 sps:$4 sm:$0xff]  }
  0x20   : > { %v1990_v29 = vld [vmem:[%s2739_s3 + $0xc0] ss:$16 sps:$4 sm:$0xff]   ;;  %v1991_v30 = vld [vmem:[%s2739_s3 + $0xc8] ss:$16 sps:$4 sm:$0xff]   ;;  %v1992_v31 = vld [vmem:[%s2739_s3 + $0xe4] ss:$16 sps:$4 sm:$0xff]  }
  0x21   : > { %v1994_v32 = vld [vmem:[%s2739_s3 + $0xec] ss:$16 sps:$4 sm:$0xff]   ;;  %v1996_v33 = vld [vmem:[%s2739_s3 + $0xe0] ss:$16 sps:$4 sm:$0xff]   ;;  %v1997_v34 = vld [vmem:[%s2739_s3 + $0xe8] ss:$16 sps:$4 sm:$0xff]  }
  0x22   : > { %693 = vmatpush1.bf16.msra.mxu0 %v1966_v13  ;;  %746 = vmatpush1.bf16.msra.mxu1 %v1967_v14  ;;  %v2341_v35 = vld [vmem:[%s2740_s4 + $0x4] ss:$16 sps:$4 sm:$0xff]   ;;  %v2346_v36 = vld [vmem:[%s2740_s4 + $0xc] ss:$16 sps:$4 sm:$0xff]   ;;  %v2352_v38 = vld [vmem:[%s2740_s4] ss:$16 sps:$4 sm:$0xff]  }
  0x23   : > { %694 = vmatprep.subr.bf16.mxu0 %v1968_v15  ;;  %747 = vmatprep.subr.bf16.mxu1 %v1970_v16  ;;  %v1998_v37 = vld [vmem:[%s2226_s22] sm:$0xff]   ;;  %v2357_v39 = vld [vmem:[%s2740_s4 + $0x8] ss:$16 sps:$4 sm:$0xff]   ;;  %v2369_v41 = vld [vmem:[%s2740_s4 + $0x2c] ss:$16 sps:$4 sm:$0xff]   ;;  %v497_v9 = vshrl.u32 %v496_v8, 7 }
  0x24   : > { %v2362_v40 = vld [vmem:[%s2740_s4 + $0x24] ss:$16 sps:$4 sm:$0xff]   ;;  %v2374_v42 = vld [vmem:[%s2740_s4 + $0x20] ss:$16 sps:$4 sm:$0xff]   ;;  %v2379_v43 = vld [vmem:[%s2740_s4 + $0x28] ss:$16 sps:$4 sm:$0xff]  }
  0x25   : > { %v2386_v44 = vld [vmem:[%s2740_s4 + $0x44] ss:$16 sps:$4 sm:$0xff]   ;;  %v2393_v45 = vld [vmem:[%s2740_s4 + $0x4c] ss:$16 sps:$4 sm:$0xff]   ;;  %v2398_v46 = vld [vmem:[%s2740_s4 + $0x40] ss:$16 sps:$4 sm:$0xff]  }
  0x26   : > { %695 = vmatpush1.bf16.msra.mxu0 %v1972_v17  ;;  %748 = vmatpush1.bf16.msra.mxu1 %v1973_v18  ;;  %v2033_v47 = vld [vmem:[%s2226_s22 + $0x8] sm:$0xff]   ;;  %v2415_v49 = vld [vmem:[%s2740_s4 + $0x64] ss:$16 sps:$4 sm:$0xff]   ;;  %v2427_v51 = vld [vmem:[%s2740_s4 + $0x60] ss:$16 sps:$4 sm:$0xff]   ;;  %v498_v10 = vsub.s32 0, %v497_v9 }
  0x27   : > { %696 = vmatprep.subr.bf16.mxu0 %v1974_v19  ;;  %749 = vmatprep.subr.bf16.mxu1 %v1976_v20  ;;  %v2408_v48 = vld [vmem:[%s2740_s4 + $0x48] ss:$16 sps:$4 sm:$0xff]   ;;  %v2420_v50 = vld [vmem:[%s2740_s4 + $0x6c] ss:$16 sps:$4 sm:$0xff]   ;;  %v2437_v53 = vld [vmem:[%s2740_s4 + $0x84] ss:$16 sps:$4 sm:$0xff]  }
  0x28   : > { %v2432_v52 = vld [vmem:[%s2740_s4 + $0x68] ss:$16 sps:$4 sm:$0xff]   ;;  %v2444_v54 = vld [vmem:[%s2740_s4 + $0x8c] ss:$16 sps:$4 sm:$0xff]   ;;  %v2449_v55 = vld [vmem:[%s2740_s4 + $0x80] ss:$16 sps:$4 sm:$0xff]  }
  0x29   : > { %v2454_v56 = vld [vmem:[%s2740_s4 + $0x88] ss:$16 sps:$4 sm:$0xff]   ;;  %v2461_v57 = vld [vmem:[%s2740_s4 + $0xa4] ss:$16 sps:$4 sm:$0xff]   ;;  %v2466_v58 = vld [vmem:[%s2740_s4 + $0xac] ss:$16 sps:$4 sm:$0xff]  }
  0x2a   : > { %697 = vmatpush1.bf16.msra.mxu0 %v1978_v21  ;;  %750 = vmatpush1.bf16.msra.mxu1 %v1979_v22  ;;  %v2477_v59 = vld [vmem:[%s2740_s4 + $0xa0] ss:$16 sps:$4 sm:$0xff]   ;;  %v2482_v60 = vld [vmem:[%s2740_s4 + $0xa8] ss:$16 sps:$4 sm:$0xff]   ;;  %v2489_v61 = vld [vmem:[%s2740_s4 + $0xc4] ss:$16 sps:$4 sm:$0xff]  }
  0x2b   : > { %698 = vmatprep.subr.bf16.mxu0 %v1980_v23  ;;  %751 = vmatprep.subr.bf16.mxu1 %v1982_v24  ;;  %v2494_v62 = vld [vmem:[%s2740_s4 + $0xcc] ss:$16 sps:$4 sm:$0xff]   ;;  %v2501_v63 = vld [vmem:[%s2740_s4 + $0xc0] ss:$16 sps:$4 sm:$0xff]   ;;  %v2506_v0 = vld [vmem:[%s2740_s4 + $0xc8] ss:$16 sps:$4 sm:$0xff]  }
  0x2c   : > { %v2513_v1 = vld [vmem:[%s2740_s4 + $0xe4] ss:$16 sps:$4 sm:$0xff]   ;;  %v2518_v2 = vld [vmem:[%s2740_s4 + $0xec] ss:$16 sps:$4 sm:$0xff]   ;;  %v2525_v3 = vld [vmem:[%s2740_s4 + $0xe0] ss:$16 sps:$4 sm:$0xff]  }
  0x2d   : > { %v2530_v5 = vld [vmem:[%s2740_s4 + $0xe8] ss:$16 sps:$4 sm:$0xff]   ;;  %v842_v6 = vld [vmem:[#allocation2] sm:$0xff]  ;;  %v506_v11 = vsub.s32 2, %v497_v9  ;;  %v510_v13 = vsub.s32 3, %v497_v9  ;;  %v502_v14 = vsub.s32 1, %v497_v9 }
  0x2e   : > { %699 = vmatpush1.bf16.msra.mxu0 %v1984_v25  ;;  %752 = vmatpush1.bf16.msra.mxu1 %v1985_v26  ;;  %v848_v7 = vpack.c.bf16 %v842_v6, %v842_v6  ;;  %v494_v12 = vld [vmem:[%s2741_s5] sm:$0xf] }
  0x2f   : > { %700 = vmatprep.subr.bf16.mxu0 %v1986_v27  ;;  %753 = vmatprep.subr.bf16.mxu1 %v1988_v28  ;;  %v499_v15 = vrot.slane %v494_v12, %v498_v10  ;;  %v507_v16 = vrot.slane %v494_v12, %v506_v11  ;;  %v511_v19 = vrot.slane %v494_v12, %v510_v13 }
  0x30   : > { %v503_v22 = vrot.slane %v494_v12, %v502_v14 }
  0x32   : > { %701 = vmatpush1.bf16.msra.mxu0 %v1990_v29  ;;  %754 = vmatpush1.bf16.msra.mxu1 %v1991_v30 }
  0x33   : > { %702 = vmatprep.subr.bf16.mxu0 %v1992_v31  ;;  %755 = vmatprep.subr.bf16.mxu1 %v1994_v32 }
  0x36   : > { %703 = vmatpush1.bf16.msra.mxu0 %v1996_v33  ;;  %756 = vmatpush1.bf16.msra.mxu1 %v1997_v34 }
  0x37   : > { %1009 = vmatprep.subr.bf16.mxu0 %v2341_v35  ;;  %1050 = vmatprep.subr.bf16.mxu1 %v2346_v36 }
  0x39   : > { %721 = vmatmul.mubr.bf16.vlgmr.msra.gmra.mrb[0].mxu0 %v1998_v37  ;;  %774 = vmatmul.mubr.bf16.vlgmr.msra.gmra.mrb[0].mxu1 %v1998_v37 }
  0x3a   : > { %1010 = vmatpush1.bf16.msra.mxu0 %v2352_v38  ;;  %1051 = vmatpush1.bf16.msra.mxu1 %v2357_v39 }
  0x3b   : > { %1011 = vmatprep.subr.bf16.mxu0 %v2362_v40  ;;  %1052 = vmatprep.subr.bf16.mxu1 %v2369_v41 }
  0x3c   : > { %730 = vmatprep.mubr.bf16.mxu0 %v2747_v4  ;;  %783 = vmatprep.mubr.bf16.mxu1 %v2747_v4 }
  0x3e   : > { %1012 = vmatpush1.bf16.msra.mxu0 %v2374_v42  ;;  %1053 = vmatpush1.bf16.msra.mxu1 %v2379_v43 }
  0x3f   : > { %1013 = vmatprep.subr.bf16.mxu0 %v2386_v44  ;;  %1054 = vmatprep.subr.bf16.mxu1 %v2393_v45 }
  0x41   : > { %731 = vmatmul.mubr.bf16.gmra.mrb[4].mxu0 %v2033_v47  ;;  %784 = vmatmul.mubr.bf16.gmra.mrb[4].mxu1 %v2033_v47 }
  0x42   : > { %1014 = vmatpush1.bf16.msra.mxu0 %v2398_v46  ;;  %1055 = vmatpush1.bf16.msra.mxu1 %v2408_v48 }
  0x43   : > { %1015 = vmatprep.subr.bf16.mxu0 %v2415_v49  ;;  %1056 = vmatprep.subr.bf16.mxu1 %v2420_v50 }
  0x44   : > { %1041 = vmatprep.mubr.bf16.mxu0 %v2747_v4  ;;  %1082 = vmatprep.mubr.bf16.mxu1 %v2747_v4 }
  0x46   : > { %1016 = vmatpush1.bf16.msra.mxu0 %v2427_v51  ;;  %1057 = vmatpush1.bf16.msra.mxu1 %v2432_v52 }
  0x47   : > { %1017 = vmatprep.subr.bf16.mxu0 %v2437_v53  ;;  %1058 = vmatprep.subr.bf16.mxu1 %v2444_v54 }
  0x4a   : > { %1018 = vmatpush1.bf16.msra.mxu0 %v2449_v55  ;;  %1059 = vmatpush1.bf16.msra.mxu1 %v2454_v56 }
  0x4b   : > { %1019 = vmatprep.subr.bf16.mxu0 %v2461_v57  ;;  %1060 = vmatprep.subr.bf16.mxu1 %v2466_v58 }
  0x4e   : > { %1020 = vmatpush1.bf16.msra.mxu0 %v2477_v59  ;;  %1061 = vmatpush1.bf16.msra.mxu1 %v2482_v60 }
  0x4f   : > { %1021 = vmatprep.subr.bf16.mxu0 %v2489_v61  ;;  %1062 = vmatprep.subr.bf16.mxu1 %v2494_v62 }
  0x52   : > { %1022 = vmatpush1.bf16.msra.mxu0 %v2501_v63  ;;  %1063 = vmatpush1.bf16.msra.mxu1 %v2506_v0 }
  0x53   : > { %1023 = vmatprep.subr.bf16.mxu0 %v2513_v1  ;;  %1064 = vmatprep.subr.bf16.mxu1 %v2518_v2 }
  0x56   : > { %1024 = vmatpush1.bf16.msra.mxu0 %v2525_v3  ;;  %1065 = vmatpush1.bf16.msra.mxu1 %v2530_v5 }
  0x57   : > { %1126 = vmatprep.subr.bf16.mxu0 %v2341_v35  ;;  %1167 = vmatprep.subr.bf16.mxu1 %v2346_v36 }
  0x59   : > { %1042 = vmatmul.mubr.bf16.vlgmr.msra.gmra.mrb[8].mxu0 %v848_v7  ;;  %1083 = vmatmul.mubr.bf16.vlgmr.msra.gmra.mrb[8].mxu1 %v848_v7 }
  0x5a   : > { %1127 = vmatpush1.bf16.msra.mxu0 %v2352_v38  ;;  %1168 = vmatpush1.bf16.msra.mxu1 %v2357_v39 }
  0x5b   : > { %1128 = vmatprep.subr.bf16.mxu0 %v2362_v40  ;;  %1169 = vmatprep.subr.bf16.mxu1 %v2369_v41 }
  0x5c   : > { %1158 = vmatprep.mubr.bf16.mxu0 %v2747_v4  ;;  %1199 = vmatprep.mubr.bf16.mxu1 %v2747_v4 }
  0x5e   : > { %1129 = vmatpush1.bf16.msra.mxu0 %v2374_v42  ;;  %1170 = vmatpush1.bf16.msra.mxu1 %v2379_v43 }
  0x5f   : > { %1130 = vmatprep.subr.bf16.mxu0 %v2386_v44  ;;  %1171 = vmatprep.subr.bf16.mxu1 %v2393_v45 }
  0x62   : > { %1131 = vmatpush1.bf16.msra.mxu0 %v2398_v46  ;;  %1172 = vmatpush1.bf16.msra.mxu1 %v2408_v48 }
  0x63   : > { %1132 = vmatprep.subr.bf16.mxu0 %v2415_v49  ;;  %1173 = vmatprep.subr.bf16.mxu1 %v2420_v50 }
  0x66   : > { %1133 = vmatpush1.bf16.msra.mxu0 %v2427_v51  ;;  %1174 = vmatpush1.bf16.msra.mxu1 %v2432_v52 }
  0x67   : > { %1134 = vmatprep.subr.bf16.mxu0 %v2437_v53  ;;  %1175 = vmatprep.subr.bf16.mxu1 %v2444_v54 }
  0x6a   : > { %1135 = vmatpush1.bf16.msra.mxu0 %v2449_v55  ;;  %1176 = vmatpush1.bf16.msra.mxu1 %v2454_v56 }
  0x6b   : > { %1136 = vmatprep.subr.bf16.mxu0 %v2461_v57  ;;  %1177 = vmatprep.subr.bf16.mxu1 %v2466_v58 }
  0x6e   : > { %1137 = vmatpush1.bf16.msra.mxu0 %v2477_v59  ;;  %1178 = vmatpush1.bf16.msra.mxu1 %v2482_v60 }
  0x6f   : > { %1138 = vmatprep.subr.bf16.mxu0 %v2489_v61  ;;  %1179 = vmatprep.subr.bf16.mxu1 %v2494_v62 }
  0x72   : > { %1139 = vmatpush1.bf16.msra.mxu0 %v2501_v63  ;;  %1180 = vmatpush1.bf16.msra.mxu1 %v2506_v0 }
  0x73   : > { %1140 = vmatprep.subr.bf16.mxu0 %v2513_v1  ;;  %1181 = vmatprep.subr.bf16.mxu1 %v2518_v2 }
  0x76   : > { %1141 = vmatpush1.bf16.msra.mxu0 %v2525_v3  ;;  %1182 = vmatpush1.bf16.msra.mxu1 %v2530_v5 }
  0x77   : > { %1244 = vmatprep.subr.bf16.mxu0 %v2341_v35  ;;  %1285 = vmatprep.subr.bf16.mxu1 %v2346_v36 }
 0x10c   : > { %v722_v17 = vpop.f32.mrb[0].mxu0  ;;  %v775_v18 = vpop.f32.mrb[0].mxu1 }
 0x10d   : > { %v724_v20 = vpop.f32.mrb[1].mxu0  ;;  %v777_v21 = vpop.f32.mrb[1].mxu1 }
 0x10e   : > { %v726_v23 = vpop.f32.mrb[2].mxu0  ;;  %v779_v24 = vpop.f32.mrb[2].mxu1 }
 0x10f   : > { %v2575_v25 = vadd.f32 %v726_v23, %v499_v15  ;;  %v728_v26 = vpop.f32.mrb[3].mxu0  ;;  %v2577_v27 = vadd.f32 %v779_v24, %v507_v16  ;;  %v781_v28 = vpop.f32.mrb[3].mxu1  ;;  %v723_v24 = vadd.f32 %v722_v17, %v499_v15 }
 0x110   : > { %v2579_v29 = vadd.f32 %v728_v26, %v503_v22  ;;  %v2581_v30 = vadd.f32 %v781_v28, %v511_v19  ;;  %v776_v26 = vadd.f32 %v775_v18, %v507_v16  ;;  %v725_v28 = vadd.f32 %v724_v20, %v503_v22 }
 0x114   : > { %v732_v31 = vpop.f32.mrb[4].mxu0  ;;  %v785_v32 = vpop.f32.mrb[4].mxu1 }
 0x115   : > { %v2583_v33 = vadd.f32 %v732_v31, %v499_v15  ;;  %v734_v34 = vpop.f32.mrb[5].mxu0  ;;  %v2585_v37 = vadd.f32 %v785_v32, %v507_v16  ;;  %v787_v47 = vpop.f32.mrb[5].mxu1  ;;  %v778_v31 = vadd.f32 %v777_v21, %v511_v19 }
 0x116   : > { %v2587_v6 = vadd.f32 %v734_v34, %v503_v22  ;;  %v736_v7 = vpop.f32.mrb[6].mxu0  ;;  %v2589_v8 = vadd.f32 %v787_v47, %v511_v19  ;;  %v789_v9 = vpop.f32.mrb[6].mxu1 }
 0x117   : > { %2749 = vst [vmem:[#allocation6_spill] sm:$0xff] %v2583_v33  ;;  %2750 = vst [vmem:[#allocation7_spill] sm:$0xff] %v2585_v37  ;;  %v2591_v10 = vadd.f32 %v736_v7, %v499_v15  ;;  %v738_v11 = vpop.f32.mrb[7].mxu0  ;;  %v2593_v12 = vadd.f32 %v789_v9, %v507_v16  ;;  %v791_v13 = vpop.f32.mrb[7].mxu1 }
 0x118   : > { %2751 = vst [vmem:[#allocation8_spill] sm:$0xff] %v2587_v6  ;;  %2752 = vst [vmem:[#allocation9_spill] sm:$0xff] %v2589_v8  ;;  %v2595_v14 = vadd.f32 %v738_v11, %v503_v22  ;;  %v2597_v23 = vadd.f32 %v791_v13, %v511_v19  ;;  %v843_v22 = vld [vmem:[#allocation3] sm:$0xff] }
 0x119   : > { %2753 = vst [vmem:[#allocation10_spill] sm:$0xff] %v2591_v10  ;;  %2754 = vst [vmem:[#allocation11_spill] sm:$0xff] %v2593_v12 }
 0x11a   : > { %2755 = vst [vmem:[#allocation12_spill] sm:$0xff] %v2595_v14 }
 0x12c   : > { %v1043_v32 = vpop.f32.mrb[8].mxu0  ;;  %v1084_v34 = vpop.f32.mrb[8].mxu1 }
 0x12d   : > { %v1091_v4 = vadd.f32 %v1043_v32, %v723_v24  ;;  %v1093_v47 = vadd.f32 %v1084_v34, %v776_v26  ;;  %v1045_v8 = vpop.f32.mrb[9].mxu0  ;;  %v1086_v6 = vpop.f32.mrb[9].mxu1  ;;  %v2756_v26 = vmov 0  }
 0x12e   : > { %v1092_v7 = vadd.f32 %v1045_v8, %v725_v28  ;;  %v1094_v10 = vadd.f32 %v1086_v6, %v778_v31  ;;  %v1047_v37 = vpop.f32.mrb[10].mxu0  ;;  %v1088_v9 = vpop.f32.mrb[10].mxu1 }
 0x12f   : > { %v1867_v12 = vmul.f32 -1.442695, %v1091_v4  ;;  %v1048_v33 = vpop.f32.mrb[11].mxu0  ;;  %v1089_v11 = vpop.f32.mrb[11].mxu1 }
 0x130   : > { %v1868_v14 = vmul.f32 -1.442695, %v1092_v7  ;;  %v1869_v15 = vmul.f32 -1.442695, %v1094_v10 }
 0x131   : > { %2058 = vpow2.f32 %v1867_v12 }
 0x132   : > { %2060 = vpow2.f32 %v1868_v14 }
 0x133   : > { %2062 = vpow2.f32 %v1869_v15 }
 0x134   : > { %2064 = vtanh.f32 %v1093_v47 }
 0x13b   : > { %v2059_v16 = vpop.eup %2058 }
 0x13c   : > { %v2061_v17 = vpop.eup %2060  ;;  %v1098_v18 = vadd.f32 1.0, %v2059_v16 }
 0x13d   : > { %v1104_v19 = vadd.f32 1.0, %v2061_v17  ;;  %v2063_v20 = vpop.eup %2062 }
 0x13e   : > { %2066 = vrcp.f32 %v1098_v18  ;;  %v2065_v21 = vpop.eup %2064  ;;  %v1111_v33 = vadd.f32 1.0, %v2063_v20 }
 0x13f   : > { %2068 = vrcp.f32 %v1104_v19 }
 0x140   : > { %2070 = vrcp.f32 %v1111_v33 }
 0x148   : > { %v2067_v37 = vpop.eup %2066 }
 0x149   : > { %v2069_v6 = vpop.eup %2068  ;;  %v1115_v4 = vmul.f32 %v2067_v37, %v2065_v21 }
 0x14a   : > { %v1114_v8 = vmul.f32 %v2069_v6, %v843_v22  ;;  %v2071_v10 = vpop.eup %2070 }
 0x14c   : > { %v2599_v13 = vadd.f32 %v1115_v4, %v1114_v8 }
 0x14e   : > { %2072 = vtanh.f32 %v2599_v13 }
 0x158   : > { %v2073_v12 = vpop.eup %2072 }
 0x159   : > { %v1118_v14 = vmul.f32 %v2073_v12, %v2071_v10 }
 0x15b   : > { %v1119_v24 = vpack.c.bf16 %v1118_v14, %v1118_v14 }
 0x15d   : > { %1120 = vst [vmem:[#allocation5] sm:$0xf] %v1119_v24  ;;  %1159 = vmatmul.mubr.bf16.vlgmr.msra.gmra.mrb[12].mxu0 %v1119_v24  ;;  %1200 = vmatmul.mubr.bf16.vlgmr.msra.gmra.mrb[12].mxu1 %v1119_v24 }
 0x15e   : > { %1245 = vmatpush1.bf16.msra.mxu0 %v2352_v38  ;;  %1286 = vmatpush1.bf16.msra.mxu1 %v2357_v39 }
 0x15f   : > { %1246 = vmatprep.subr.bf16.mxu0 %v2362_v40  ;;  %1287 = vmatprep.subr.bf16.mxu1 %v2369_v41 }
 0x160   : > { %1276 = vmatprep.mubr.bf16.mxu0 %v2756_v26  ;;  %1317 = vmatprep.mubr.bf16.mxu1 %v2756_v26 }
 0x162   : > { %1247 = vmatpush1.bf16.msra.mxu0 %v2374_v42  ;;  %1288 = vmatpush1.bf16.msra.mxu1 %v2379_v43 }
 0x163   : > { %1248 = vmatprep.subr.bf16.mxu0 %v2386_v44  ;;  %1289 = vmatprep.subr.bf16.mxu1 %v2393_v45 }
 0x166   : > { %1249 = vmatpush1.bf16.msra.mxu0 %v2398_v46  ;;  %1290 = vmatpush1.bf16.msra.mxu1 %v2408_v48 }
 0x167   : > { %1250 = vmatprep.subr.bf16.mxu0 %v2415_v49  ;;  %1291 = vmatprep.subr.bf16.mxu1 %v2420_v50 }
 0x16a   : > { %1251 = vmatpush1.bf16.msra.mxu0 %v2427_v51  ;;  %1292 = vmatpush1.bf16.msra.mxu1 %v2432_v52 }
 0x16b   : > { %1252 = vmatprep.subr.bf16.mxu0 %v2437_v53  ;;  %1293 = vmatprep.subr.bf16.mxu1 %v2444_v54 }
 0x16e   : > { %1253 = vmatpush1.bf16.msra.mxu0 %v2449_v55  ;;  %1294 = vmatpush1.bf16.msra.mxu1 %v2454_v56 }
 0x16f   : > { %1254 = vmatprep.subr.bf16.mxu0 %v2461_v57  ;;  %1295 = vmatprep.subr.bf16.mxu1 %v2466_v58 }
 0x172   : > { %1255 = vmatpush1.bf16.msra.mxu0 %v2477_v59  ;;  %1296 = vmatpush1.bf16.msra.mxu1 %v2482_v60 }
 0x173   : > { %1256 = vmatprep.subr.bf16.mxu0 %v2489_v61  ;;  %1297 = vmatprep.subr.bf16.mxu1 %v2494_v62 }
 0x176   : > { %1257 = vmatpush1.bf16.msra.mxu0 %v2501_v63  ;;  %1298 = vmatpush1.bf16.msra.mxu1 %v2506_v0 }
 0x177   : > { %1258 = vmatprep.subr.bf16.mxu0 %v2513_v1  ;;  %1299 = vmatprep.subr.bf16.mxu1 %v2518_v2 }
 0x17a   : > { %1259 = vmatpush1.bf16.msra.mxu0 %v2525_v3  ;;  %1300 = vmatpush1.bf16.msra.mxu1 %v2530_v5 }
 0x17b   : > { %1362 = vmatprep.subr.bf16.mxu0 %v2341_v35  ;;  %1403 = vmatprep.subr.bf16.mxu1 %v2346_v36 }
 0x230   : > { %v1160_v28 = vpop.f32.mrb[12].mxu0  ;;  %v1201_v31 = vpop.f32.mrb[12].mxu1 }
 0x231   : > { %v1208_v32 = vadd.f32 %v1160_v28, %v2575_v25  ;;  %v1210_v34 = vadd.f32 %v1201_v31, %v2577_v27  ;;  %v1162_v47 = vpop.f32.mrb[13].mxu0  ;;  %v1203_v7 = vpop.f32.mrb[13].mxu1 }
 0x232   : > { %v1209_v9 = vadd.f32 %v1162_v47, %v2579_v29  ;;  %v1211_v11 = vadd.f32 %v1203_v7, %v2581_v30  ;;  %v1164_v15 = vpop.f32.mrb[14].mxu0  ;;  %v1205_v16 = vpop.f32.mrb[14].mxu1  ;;  %v2049_v47 = vld [vmem:[%s2742_s6] sm:$0xff]   ;;  %v2050_v7 = vld [vmem:[%s2742_s6 + $0x8] sm:$0xff]  }
 0x233   : > { %v1870_v17 = vmul.f32 -1.442695, %v1208_v32  ;;  %v1165_v18 = vpop.f32.mrb[15].mxu0  ;;  %v1206_v19 = vpop.f32.mrb[15].mxu1  ;;  %v2053_v15 = vld [vmem:[%s2742_s6 + $0x20] sm:$0xff]   ;;  %v2054_v16 = vld [vmem:[%s2742_s6 + $0x28] sm:$0xff]  }
 0x234   : > { %v1871_v35 = vmul.f32 -1.442695, %v1209_v9  ;;  %v1872_v36 = vmul.f32 -1.442695, %v1211_v11  ;;  %v2051_v9 = vld [vmem:[%s2742_s6 + $0x10] sm:$0xff]   ;;  %v2052_v11 = vld [vmem:[%s2742_s6 + $0x18] sm:$0xff]  }
 0x235   : > { %2074 = vpow2.f32 %v1870_v17  ;;  %v2055_v17 = vld [vmem:[%s2742_s6 + $0x30] sm:$0xff]   ;;  %v2056_v18 = vld [vmem:[%s2742_s6 + $0x38] sm:$0xff]  }
 0x236   : > { %2076 = vpow2.f32 %v1871_v35 }
 0x237   : > { %2078 = vpow2.f32 %v1872_v36  ;;  %v2761_v36 = vld [vmem:[#allocation10_spill] sm:$0xff] }
 0x238   : > { %2080 = vtanh.f32 %v1210_v34 }
 0x23f   : > { %v2075_v20 = vpop.eup %2074 }
 0x240   : > { %v2077_v21 = vpop.eup %2076  ;;  %v1215_v25 = vadd.f32 1.0, %v2075_v20 }
 0x241   : > { %v1221_v27 = vadd.f32 1.0, %v2077_v21  ;;  %v2079_v29 = vpop.eup %2078  ;;  %v2762_v21 = vld [vmem:[#allocation11_spill] sm:$0xff] }
 0x242   : > { %2082 = vrcp.f32 %v1215_v25  ;;  %v2081_v22 = vpop.eup %2080  ;;  %v1228_v4 = vadd.f32 1.0, %v2079_v29 }
 0x243   : > { %2084 = vrcp.f32 %v1221_v27 }
 0x244   : > { %2086 = vrcp.f32 %v1228_v4 }
 0x24c   : > { %v2083_v30 = vpop.eup %2082 }
 0x24d   : > { %v2085_v37 = vpop.eup %2084  ;;  %v1232_v6 = vmul.f32 %v2083_v30, %v2081_v22  ;;  %v2763_v22 = vld [vmem:[#allocation12_spill] sm:$0xff] }
 0x24e   : > { %v1231_v33 = vmul.f32 %v2085_v37, %v2599_v13  ;;  %v2087_v10 = vpop.eup %2086 }
 0x250   : > { %v2641_v8 = vadd.f32 %v1232_v6, %v1231_v33 }
 0x252   : > { %2088 = vtanh.f32 %v2641_v8 }
 0x25c   : > { %v2089_v12 = vpop.eup %2088 }
 0x25d   : > { %v1235_v14 = vmul.f32 %v2089_v12, %v2087_v10 }
 0x25f   : > { %v1236_v24 = vpack.c.bf16 %v1235_v14, %v1235_v14 }
 0x261   : > { %1238 = vst [vmem:[#allocation5 + $0x4] sm:$0xf] %v1236_v24  ;;  %1277 = vmatmul.mubr.bf16.vlgmr.msra.gmra.mrb[16].mxu0 %v1236_v24  ;;  %1318 = vmatmul.mubr.bf16.vlgmr.msra.gmra.mrb[16].mxu1 %v1236_v24 }
 0x262   : > { %1363 = vmatpush1.bf16.msra.mxu0 %v2352_v38  ;;  %1404 = vmatpush1.bf16.msra.mxu1 %v2357_v39 }
 0x263   : > { %1364 = vmatprep.subr.bf16.mxu0 %v2362_v40  ;;  %1405 = vmatprep.subr.bf16.mxu1 %v2369_v41  ;;  %v2757_v40 = vld [vmem:[#allocation6_spill] sm:$0xff] }
 0x264   : > { %1394 = vmatprep.mubr.bf16.mxu0 %v2756_v26  ;;  %1435 = vmatprep.mubr.bf16.mxu1 %v2756_v26 }
 0x266   : > { %1365 = vmatpush1.bf16.msra.mxu0 %v2374_v42  ;;  %1406 = vmatpush1.bf16.msra.mxu1 %v2379_v43  ;;  %v2758_v42 = vld [vmem:[#allocation7_spill] sm:$0xff] }
 0x267   : > { %1366 = vmatprep.subr.bf16.mxu0 %v2386_v44  ;;  %1407 = vmatprep.subr.bf16.mxu1 %v2393_v45 }
 0x268   : > { %v2048_v34 = vld [vmem:[#allocation5] sm:$0xff]  }
 0x26a   : > { %1367 = vmatpush1.bf16.msra.mxu0 %v2398_v46  ;;  %1408 = vmatpush1.bf16.msra.mxu1 %v2408_v48  ;;  %v2759_v46 = vld [vmem:[#allocation8_spill] sm:$0xff] }
 0x26b   : > { %1368 = vmatprep.subr.bf16.mxu0 %v2415_v49  ;;  %1409 = vmatprep.subr.bf16.mxu1 %v2420_v50  ;;  %v2760_v49 = vld [vmem:[#allocation9_spill] sm:$0xff] }
 0x26e   : > { %1369 = vmatpush1.bf16.msra.mxu0 %v2427_v51  ;;  %1410 = vmatpush1.bf16.msra.mxu1 %v2432_v52 }
 0x26f   : > { %1370 = vmatprep.subr.bf16.mxu0 %v2437_v53  ;;  %1411 = vmatprep.subr.bf16.mxu1 %v2444_v54 }
 0x272   : > { %1371 = vmatpush1.bf16.msra.mxu0 %v2449_v55  ;;  %1412 = vmatpush1.bf16.msra.mxu1 %v2454_v56 }
 0x273   : > { %1372 = vmatprep.subr.bf16.mxu0 %v2461_v57  ;;  %1413 = vmatprep.subr.bf16.mxu1 %v2466_v58 }
 0x276   : > { %1373 = vmatpush1.bf16.msra.mxu0 %v2477_v59  ;;  %1414 = vmatpush1.bf16.msra.mxu1 %v2482_v60 }
 0x277   : > { %1374 = vmatprep.subr.bf16.mxu0 %v2489_v61  ;;  %1415 = vmatprep.subr.bf16.mxu1 %v2494_v62 }
 0x27a   : > { %1375 = vmatpush1.bf16.msra.mxu0 %v2501_v63  ;;  %1416 = vmatpush1.bf16.msra.mxu1 %v2506_v0 }
 0x27b   : > { %1376 = vmatprep.subr.bf16.mxu0 %v2513_v1  ;;  %1417 = vmatprep.subr.bf16.mxu1 %v2518_v2 }
 0x27e   : > { %1377 = vmatpush1.bf16.msra.mxu0 %v2525_v3  ;;  %1418 = vmatpush1.bf16.msra.mxu1 %v2530_v5 }
 0x27f   : > { %1905 = vmatprep.subr.bf16.mxu0 %v2049_v47 }
 0x334   : > { %v1278_v38 = vpop.f32.mrb[16].mxu0  ;;  %v1319_v39 = vpop.f32.mrb[16].mxu1 }
 0x335   : > { %v1326_v41 = vadd.f32 %v1278_v38, %v2757_v40  ;;  %v1328_v43 = vadd.f32 %v1319_v39, %v2758_v42  ;;  %v1280_v44 = vpop.f32.mrb[17].mxu0  ;;  %v1321_v45 = vpop.f32.mrb[17].mxu1 }
 0x336   : > { %v1327_v48 = vadd.f32 %v1280_v44, %v2759_v46  ;;  %v1329_v50 = vadd.f32 %v1321_v45, %v2760_v49  ;;  %v1282_v51 = vpop.f32.mrb[18].mxu0  ;;  %v1323_v52 = vpop.f32.mrb[18].mxu1 }
 0x337   : > { %v1873_v53 = vmul.f32 -1.442695, %v1326_v41  ;;  %v1283_v54 = vpop.f32.mrb[19].mxu0  ;;  %v1324_v55 = vpop.f32.mrb[19].mxu1 }
 0x338   : > { %v1874_v56 = vmul.f32 -1.442695, %v1327_v48  ;;  %v1875_v57 = vmul.f32 -1.442695, %v1329_v50  ;;  %v1879_v54 = vld [vmem:[%s2743_s7] ss:$0 sm:$0xff] }
 0x339   : > { %2090 = vpow2.f32 %v1873_v53 }
 0x33a   : > { %2092 = vpow2.f32 %v1874_v56 }
 0x33b   : > { %2094 = vpow2.f32 %v1875_v57 }
 0x33c   : > { %2096 = vtanh.f32 %v1328_v43 }
 0x343   : > { %v2091_v58 = vpop.eup %2090 }
 0x344   : > { %v2093_v59 = vpop.eup %2092  ;;  %v1333_v60 = vadd.f32 1.0, %v2091_v58 }
 0x345   : > { %v1339_v61 = vadd.f32 1.0, %v2093_v59  ;;  %v2095_v62 = vpop.eup %2094 }
 0x346   : > { %2098 = vrcp.f32 %v1333_v60  ;;  %v2097_v63 = vpop.eup %2096  ;;  %v1346_v3 = vadd.f32 1.0, %v2095_v62 }
 0x347   : > { %2100 = vrcp.f32 %v1339_v61 }
 0x348   : > { %2102 = vrcp.f32 %v1346_v3 }
 0x350   : > { %v2099_v0 = vpop.eup %2098 }
 0x351   : > { %v2101_v1 = vpop.eup %2100  ;;  %v1350_v2 = vmul.f32 %v2099_v0, %v2097_v63 }
 0x352   : > { %v1349_v5 = vmul.f32 %v2101_v1, %v2641_v8  ;;  %v2103_v26 = vpop.eup %2102 }
 0x354   : > { %v2681_v13 = vadd.f32 %v1350_v2, %v1349_v5 }
 0x356   : > { %2104 = vtanh.f32 %v2681_v13 }
 0x360   : > { %v2105_v28 = vpop.eup %2104 }
 0x361   : > { %v1353_v31 = vmul.f32 %v2105_v28, %v2103_v26 }
 0x363   : > { %v1354_v32 = vpack.c.bf16 %v1353_v31, %v1353_v31 }
 0x365   : > { %1356 = vst [vmem:[#allocation5 + $0x8] sm:$0xf] %v1354_v32  ;;  %1395 = vmatmul.mubr.bf16.vlgmr.msra.gmra.mrb[20].mxu0 %v1354_v32  ;;  %1436 = vmatmul.mubr.bf16.vlgmr.msra.gmra.mrb[20].mxu1 %v1354_v32 }
 0x366   : > { %1921 = vmatprep.mubr.bf16.mxu0 %v2048_v34  ;;  %1906 = vmatpush3.bf16.msra.mxu0 %v2049_v47 }
 0x367   : > { %1907 = vmatprep.subr.bf16.mxu0 %v2050_v7 }
 0x36a   : > { %1908 = vmatpush3.bf16.msra.mxu0 %v2050_v7 }
 0x36b   : > { %1909 = vmatprep.subr.bf16.mxu0 %v2051_v9 }
 0x36e   : > { %1910 = vmatpush3.bf16.msra.mxu0 %v2051_v9 }
 0x36f   : > { %1911 = vmatprep.subr.bf16.mxu0 %v2052_v11 }
 0x372   : > { %1912 = vmatpush3.bf16.msra.mxu0 %v2052_v11 }
 0x373   : > { %1913 = vmatprep.subr.bf16.mxu0 %v2053_v15 }
 0x376   : > { %1914 = vmatpush3.bf16.msra.mxu0 %v2053_v15 }
 0x377   : > { %1915 = vmatprep.subr.bf16.mxu0 %v2054_v16 }
 0x37a   : > { %1916 = vmatpush3.bf16.msra.mxu0 %v2054_v16 }
 0x37b   : > { %1917 = vmatprep.subr.bf16.mxu0 %v2055_v17 }
 0x37e   : > { %1918 = vmatpush3.bf16.msra.mxu0 %v2055_v17 }
 0x37f   : > { %1919 = vmatprep.subr.bf16.mxu0 %v2056_v18 }
 0x382   : > { %1920 = vmatpush3.bf16.msra.mxu0 %v2056_v18 }
 0x438   : > { %v1396_v19 = vpop.f32.mrb[20].mxu0  ;;  %v1437_v35 = vpop.f32.mrb[20].mxu1 }
 0x439   : > { %v1444_v20 = vadd.f32 %v1396_v19, %v2761_v36  ;;  %v1446_v25 = vadd.f32 %v1437_v35, %v2762_v21  ;;  %v1398_v27 = vpop.f32.mrb[21].mxu0  ;;  %v1439_v29 = vpop.f32.mrb[21].mxu1 }
 0x43a   : > { %v1445_v30 = vadd.f32 %v1398_v27, %v2763_v22  ;;  %v1447_v37 = vadd.f32 %v1439_v29, %v2597_v23  ;;  %v1400_v6 = vpop.f32.mrb[22].mxu0  ;;  %v1441_v4 = vpop.f32.mrb[22].mxu1 }
 0x43b   : > { %v1876_v33 = vmul.f32 -1.442695, %v1444_v20  ;;  %v1401_v8 = vpop.f32.mrb[23].mxu0  ;;  %v1442_v10 = vpop.f32.mrb[23].mxu1 }
 0x43c   : > { %v1877_v12 = vmul.f32 -1.442695, %v1445_v30  ;;  %v1878_v14 = vmul.f32 -1.442695, %v1447_v37 }
 0x43d   : > { %2106 = vpow2.f32 %v1876_v33 }
 0x43e   : > { %2108 = vpow2.f32 %v1877_v12 }
 0x43f   : > { %2110 = vpow2.f32 %v1878_v14 }
 0x440   : > { %2112 = vtanh.f32 %v1446_v25 }
 0x447   : > { %v2107_v24 = vpop.eup %2106 }
 0x448   : > { %v2109_v38 = vpop.eup %2108  ;;  %v1451_v39 = vadd.f32 1.0, %v2107_v24 }
 0x449   : > { %v1457_v40 = vadd.f32 1.0, %v2109_v38  ;;  %v2111_v41 = vpop.eup %2110 }
 0x44a   : > { %2114 = vrcp.f32 %v1451_v39  ;;  %v2113_v42 = vpop.eup %2112  ;;  %v1464_v45 = vadd.f32 1.0, %v2111_v41 }
 0x44b   : > { %2116 = vrcp.f32 %v1457_v40 }
 0x44c   : > { %2118 = vrcp.f32 %v1464_v45 }
 0x454   : > { %v2115_v23 = vpop.eup %2114 }
 0x455   : > { %v2117_v43 = vpop.eup %2116  ;;  %v1468_v44 = vmul.f32 %v2115_v23, %v2113_v42 }
 0x456   : > { %v1467_v46 = vmul.f32 %v2117_v43, %v2681_v13  ;;  %v2119_v49 = vpop.eup %2118 }
 0x458   : > { %v1469_v48 = vadd.f32 %v1468_v44, %v1467_v46 }
 0x45a   : > { %2120 = vtanh.f32 %v1469_v48  ;;  %1476 = vst [vmem:[#allocation3] sm:$0xff] %v1469_v48 }
 0x461   : > { %v1623_v0 = vld [vmem:[#allocation3] sm:$0xff] (!%p1890_p6) }
 0x462   : > { %1624 = vst [vmem:[%s2746_s10] sm:$0xff] (!%p1890_p6), %v1623_v0 }
 0x464   : > { %v2121_v50 = vpop.eup %2120 }
 0x465   : > { %v1471_v51 = vmul.f32 %v2121_v50, %v2119_v49 }
 0x467   : > { %v1472_v52 = vpack.c.bf16 %v1471_v51, %v1471_v51  ;;  %1475 = vst [vmem:[#allocation2] sm:$0xff] %v1471_v51 }
 0x469   : > { %1474 = vst [vmem:[#allocation5 + $0xc] sm:$0xf] %v1472_v52 }
 0x46e   : > { %v1621_v63 = vld [vmem:[#allocation2] sm:$0xff] (!%p1890_p6) }
 0x46f   : > { %1622 = vst [vmem:[%s2745_s9] sm:$0xff] (!%p1890_p6), %v1621_v63 }
 0x470   : > { %v2057_v53 = vld [vmem:[#allocation5 + $0x8] sm:$0xff]  }
 0x471   : > { %1922 = vmatmul.mubr.bf16.vlgmr.msra.gmra.mrb[24].mxu0 %v2057_v53 }
 0x544   : > { %v1923_v55 = vpop.f32.mrb[24].mxu0  ;;  %1620 = sbr.rel (%p1890_p6) target bundleno = 1355 (0x54b), region = 60 }
 0x545   : > { %v1598_v56 = vpop.f32.mrb[25].mxu0  ;;  %v1607_v61 = vadd.f32 %v1923_v55, %v1879_v54 }
 0x546   : > { %v1599_v57 = vadd.f32 %v1879_v54, %v1598_v56  ;;  %v1924_v58 = vpop.f32.mrb[26].mxu0 }
 0x547   : > { %v1601_v59 = vpop.f32.mrb[27].mxu0  ;;  %v1610_v62 = vadd.f32 %v1924_v58, %v1879_v54  ;;  %1615 = vst [vmem:[%s2231_s25 + $0x10] sm:$0xff] %v1607_v61 }
 0x548   : > { %1613 = vst [vmem:[%s2231_s25] sm:$0xff] %v1599_v57  ;;  %v1602_v60 = vadd.f32 %v1879_v54, %v1601_v59 }
 0x549   : > { %1616 = vst [vmem:[%s2231_s25 + $0x18] sm:$0xff] %v1610_v62 }
 0x54a   : > { %1614 = vst [vmem:[%s2231_s25 + $0x8] sm:$0xff] %v1602_v60 }
 0x54b PF: > { %s21_s15 = sadd.s32 1, %s2144_s15   ;;  %s2764_s13 = smov %s2140_s14 }
 0x54c   : > { %p18_p7 = scmp.ge.s32.totalorder %s21_s15, 4   ;;  %s2765_s14 = smov %s2767_s16 }
 0x54e   :  { %20 = sbr.rel (!%p18_p7) target bundleno = 2 (0x2), region = 126 }

</bundles_post_ra>
